<compile_context>
chip_gen: v5e
topology: v5e:2x2
jax: 0.10.0
libtpu: 0.0.40
codegen_flags: <defaults>
</compile_context>

<pallas_src>
import jax
import jax.numpy as jnp
from jax import lax
from jax.experimental import pallas as pl
from jax.experimental.pallas import tpu as pltpu


def _round_up(x, m):
    return ((x + m - 1) // m) * m


def _pick_row_tile(H, target):
    """Largest divisor of H that is <= target (falls back to H for awkward H)."""
    target = max(1, min(int(target), H))
    best = 1
    for th in range(target, 0, -1):
        if H % th == 0:
            best = th
            break
    return best if best >= min(4, H) else H


def _derive_vmem_limit(H, W, Cin, Cout, Pp, Cs, TH):
    """vmem_limit_bytes from the actual block + scratch sizes (with headroom)."""
    f32, bf16 = 4, 2
    x_blk = H * W * Cin * f32                         # resident full-image block
    pre_blk = TH * W * Cout * f32
    rel_blk = TH * W * Cout * bf16
    wgt = (Cin * Pp + 9 * Pp * Pp + Pp * Cout) * bf16 + 3 * Cs * f32
    pad = (TH + 2) * (W + 2) * Pp * f32
    live = 4 * TH * W * max(Pp, Cout) * f32           # t1/t2/t3/window temporaries
    need = 2 * (x_blk + pre_blk + rel_blk + wgt) + pad + live
    cap = 48 << 20                                    # safe under v7x's 64 MiB physical
    try:                                              # raise toward 75% of physical (v5e/v6e)
        cap = max(cap, int(pltpu.get_tpu_info().vmem_capacity_bytes) * 3 // 4)
    except Exception:
        pass
    return int(min(max(int(need * 1.5), 32 << 20), cap))


def _bottleneck_kernel(x_ref,       # (1, H, W, Cin)     f32  full image (resident across row tiles)
                       w1_ref,      # (Cin, Pp)          bf16 (bn1 scale folded, zero-padded)
                       w2_ref,      # (9, Pp, Pp)        bf16 (HWIO taps, bn2 scale folded)
                       w3_ref,      # (Pp, Cout)         bf16 (bn3 scale folded)
                       shift_ref,   # (3, Cs)            f32  rows = bn1/bn2/bn3 shifts
                       relu_ref,    # (1, TH, W, Cout)   bf16 output: relu(out + residual)
                       pre_ref,     # (1, TH, W, Cout)   f32  output: out + residual (pre-relu)
                       pad_ref):    # VMEM (TH+2, W+2, Pp) f32 zero-halo conv2 input
    _, H, W, Cin = x_ref.shape
    Pp = w1_ref.shape[1]
    Cout = w3_ref.shape[1]
    TH = pre_ref.shape[1]

    ti = pl.program_id(1)
    nt = pl.num_programs(1)
    r0 = pl.multiple_of(ti * TH, TH)

    shift1 = shift_ref[0:1, :Pp]
    shift2 = shift_ref[1:2, :Pp]
    shift3 = shift_ref[2:3, :Cout]

    def conv1_block(x2d_f32, rows):
        # (rows*W, Cin) f32 -> relu(bn1(conv1)) as (rows, W, Pp) f32
        t = jnp.dot(x2d_f32.astype(jnp.bfloat16), w1_ref[...],
                    preferred_element_type=jnp.float32)
        return jnp.maximum(t + shift1, 0.0).reshape(rows, W, Pp)

    # Zero only the 1-wide halo columns (interior is fully overwritten each
    # step, halo rows handled below). Re-done every step -> megacore-safe.
    pad_ref[:, 0:1, :] = jnp.zeros((TH + 2, 1, Pp), jnp.float32)
    pad_ref[:, W + 1:W + 2, :] = jnp.zeros((TH + 2, 1, Pp), jnp.float32)

    # --- conv1 (1x1, scale folded) + shift + relu on the TH interior rows ----
    x_int = x_ref[:, pl.ds(r0, TH), :, :].reshape(TH * W, Cin)
    pad_ref[1:TH + 1, 1:W + 1, :] = conv1_block(x_int, TH)

    # --- conv1 halo rows (image rows r0-1 and r0+TH), zero at the image edge --
    @pl.when(ti > 0)
    def _():
        x_top = x_ref[:, pl.ds(r0 - 1, 1), :, :].reshape(W, Cin)
        pad_ref[0:1, 1:W + 1, :] = conv1_block(x_top, 1)

    @pl.when(ti == 0)
    def _():
        pad_ref[0:1, :, :] = jnp.zeros((1, W + 2, Pp), jnp.float32)

    @pl.when(ti < nt - 1)
    def _():
        x_bot = x_ref[:, pl.ds(r0 + TH, 1), :, :].reshape(W, Cin)
        pad_ref[TH + 1:TH + 2, 1:W + 1, :] = conv1_block(x_bot, 1)

    @pl.when(ti == nt - 1)
    def _():
        pad_ref[TH + 1:TH + 2, :, :] = jnp.zeros((1, W + 2, Pp), jnp.float32)

    # --- conv2 (3x3, stride=1, pad=1): 9 accumulating bf16 matmuls ------------
    t2 = None
    for dy in range(3):
        for dx in range(3):
            win = pad_ref[dy:dy + TH, dx:dx + W, :].astype(jnp.bfloat16)
            win = win.reshape(TH * W, Pp)
            d = jnp.dot(win, w2_ref[dy * 3 + dx],
                        preferred_element_type=jnp.float32)
            t2 = d if t2 is None else t2 + d
    t2 = jnp.maximum(t2 + shift2, 0.0)                          # (TH*W, Pp) f32

    # --- conv3 (1x1, scale folded) + shift + relu -----------------------------
    t3 = jnp.dot(t2.astype(jnp.bfloat16), w3_ref[...],
                 preferred_element_type=jnp.float32)
    t3 = jnp.maximum(t3 + shift3, 0.0)                          # (TH*W, Cout) f32

    # --- residual add (exact f32, re-read from the resident block) ------------
    out = t3 + x_ref[:, pl.ds(r0, TH), :, :].reshape(TH * W, Cin)
    pre_ref[0] = out.reshape(TH, W, Cout)
    relu_ref[0] = jnp.maximum(out, 0.0).reshape(TH, W, Cout).astype(relu_ref.dtype)


def prepare_params(params, compute_dtype=jnp.bfloat16):
    """Fold BN scales into conv weights, zero-pad the bottleneck width to a
    lane-dense multiple of 128, reshape w2 to per-tap (9, Pp, Pp) and pack the
    three BN shifts into one array. Done once, outside the kernel."""
    w1, s1, b1, w2, s2, b2, w3, s3, b3 = params   # w1:(Cin,P) w2:(3,3,P,P) HWIO w3:(P,Cout)
    Cin, P = w1.shape
    Cout = w3.shape[1]
    assert Cout == Cin, "identity residual path requires inplanes == planes*4"
    Pp = max(128, _round_up(P, 128))
    Cs = max(Pp, Cout)

    w1f = w1 * s1[None, :]
    w2f = w2 * s2[None, None, None, :]
    w3f = w3 * s3[None, :]

    # Zero-pad the bottleneck width P -> Pp (zeros propagate through relu since
    # the padded shift entries are zero).
    w1p = jnp.zeros((Cin, Pp), jnp.float32).at[:, :P].set(w1f)
    w2p = jnp.zeros((3, 3, Pp, Pp), jnp.float32).at[:, :, :P, :P].set(w2f)
    w3p = jnp.zeros((Pp, Cout), jnp.float32).at[:P, :].set(w3f)

    shifts = jnp.zeros((3, Cs), jnp.float32)
    shifts = shifts.at[0, :P].set(b1).at[1, :P].set(b2).at[2, :Cout].set(b3)

    return (w1p.astype(compute_dtype),
            w2p.reshape(9, Pp, Pp).astype(compute_dtype),
            w3p.astype(compute_dtype),
            shifts)


def bottleneck_pallas_nhwc(x_nhwc, kparams, *, row_tile=8, relu_dtype=jnp.bfloat16):
    """Fast path: x_nhwc (N, H, W, Cin) -> (relu_out [relu_dtype], out [f32]),
    both NHWC. relu(out) == max(out, 0) cast to relu_dtype (bf16 by default to
    halve writeback; pass jnp.float32 for the exact PyTorch dtype contract)."""
    w1, w2, w3, shifts = kparams
    N, H, W, Cin = x_nhwc.shape
    Pp = w1.shape[1]
    Cout = w3.shape[1]
    Cs = shifts.shape[1]
    assert Cin == w1.shape[0] and Cout == Cin

    x = x_nhwc.astype(jnp.float32)          # DMA f32; cast to bf16 inside the kernel
    TH = _pick_row_tile(H, row_tile)
    nt = H // TH

    grid_spec = pltpu.PrefetchScalarGridSpec(
        num_scalar_prefetch=0,
        grid=(N, nt),
        in_specs=[
            # full image, resident across the row-tile axis (only refetched per batch)
            pl.BlockSpec((1, H, W, Cin), lambda b, t: (b, 0, 0, 0)),
            pl.BlockSpec((Cin, Pp), lambda b, t: (0, 0)),
            pl.BlockSpec((9, Pp, Pp), lambda b, t: (0, 0, 0)),
            pl.BlockSpec((Pp, Cout), lambda b, t: (0, 0)),
            pl.BlockSpec((3, Cs), lambda b, t: (0, 0)),
        ],
        out_specs=[
            pl.BlockSpec((1, TH, W, Cout), lambda b, t: (b, t, 0, 0)),
            pl.BlockSpec((1, TH, W, Cout), lambda b, t: (b, t, 0, 0)),
        ],
        scratch_shapes=[
            pltpu.VMEM((TH + 2, W + 2, Pp), jnp.float32),
        ],
    )

    relu_nhwc, pre_nhwc = pl.pallas_call(
        _bottleneck_kernel,
        out_shape=(jax.ShapeDtypeStruct((N, H, W, Cout), relu_dtype),
                   jax.ShapeDtypeStruct((N, H, W, Cout), jnp.float32)),
        grid_spec=grid_spec,
        compiler_params=pltpu.CompilerParams(
            dimension_semantics=("parallel", "parallel"),
            vmem_limit_bytes=_derive_vmem_limit(H, W, Cin, Cout, Pp, Cs, TH),
        ),
    )(x, w1, w2, w3, shifts)
    return relu_nhwc, pre_nhwc


def bottleneck_pallas(x_nchw, kparams, *, row_tile=8, relu_dtype=jnp.bfloat16):
    """PyTorch-layout (NCHW) compatibility wrapper. For best performance keep
    the whole network NHWC and call bottleneck_pallas_nhwc directly (avoids the
    two full-tensor layout round trips this wrapper pays)."""
    x = jnp.transpose(x_nchw, (0, 2, 3, 1))
    relu_nhwc, pre_nhwc = bottleneck_pallas_nhwc(
        x, kparams, row_tile=row_tile, relu_dtype=relu_dtype)
    return (jnp.transpose(relu_nhwc, (0, 3, 1, 2)),
            jnp.transpose(pre_nhwc, (0, 3, 1, 2)))


def _fold_bn(gamma, beta, mean, var, eps=1e-5):
    scale = gamma / jnp.sqrt(var + eps)
    shift = beta - mean * scale
    return scale, shift


def make_params(key, inplanes, planes):
    """Deterministic synthetic parameters matching Bottleneck.__init__ shapes."""
    expansion = 4
    outplanes = planes * expansion
    ks = jax.random.split(key, 12)

    # PyTorch conv weights are (out, in, kh, kw); convert to matmul/HWIO form.
    w1_t = jax.random.normal(ks[0], (planes, inplanes, 1, 1), jnp.float32) * 0.1
    w2_t = jax.random.normal(ks[1], (planes, planes, 3, 3), jnp.float32) * 0.1
    w3_t = jax.random.normal(ks[2], (outplanes, planes, 1, 1), jnp.float32) * 0.1
    w1 = jnp.transpose(w1_t[:, :, 0, 0], (1, 0))                  # (Cin, P)
    w2 = jnp.transpose(w2_t, (2, 3, 1, 0))                        # (3,3,Pin,Pout) HWIO
    w3 = jnp.transpose(w3_t[:, :, 0, 0], (1, 0))                  # (P, Cout)

    def bn_params(kg, kb, km, kv, c):
        gamma = 1.0 + 0.1 * jax.random.normal(kg, (c,), jnp.float32)
        beta = 0.1 * jax.random.normal(kb, (c,), jnp.float32)
        mean = 0.1 * jax.random.normal(km, (c,), jnp.float32)
        var = jnp.abs(jax.random.normal(kv, (c,), jnp.float32)) + 0.5
        return _fold_bn(gamma, beta, mean, var)

    s1, b1 = bn_params(ks[3], ks[4], ks[5], ks[6], planes)
    s2, b2 = bn_params(ks[7], ks[8], ks[9], ks[10], planes)
    s3, b3 = bn_params(ks[11], ks[0], ks[1], ks[2], outplanes)
    return (w1, s1, b1, w2, s2, b2, w3, s3, b3)


def reference_forward_nhwc(x_nhwc, params):
    """Pure-JAX f32 reference of the module's forward (NHWC)."""
    w1, s1, b1, w2, s2, b2, w3, s3, b3 = params
    x = x_nhwc.astype(jnp.float32)
    t = jnp.einsum("nhwc,cp->nhwp", x, w1)
    t = jax.nn.relu(t * s1 + b1)
    t = lax.conv_general_dilated(t, w2, (1, 1), "SAME",
                                 dimension_numbers=("NHWC", "HWIO", "NHWC"))
    t = jax.nn.relu(t * s2 + b2)
    t = jnp.einsum("nhwp,pq->nhwq", t, w3)
    t = jax.nn.relu(t * s3 + b3)
    out = t + x
    return jax.nn.relu(out), out


if __name__ == "__main__":
    key = jax.random.PRNGKey(0)
    kx, kp = jax.random.split(key)

    N, planes, H, W = 2, 4, 16, 16
    inplanes = planes * 4                      # 16: identity residual path

    params = make_params(kp, inplanes, planes)
    kparams = prepare_params(params)

    # Primary TPU-friendly path: NHWC end-to-end; row_tile=8 -> 2 row tiles per
    # image, exercising the halo handling at both image boundaries.
    x_nhwc = jax.random.normal(kx, (N, H, W, inplanes), jnp.float32)
    relu_out, out = jax.block_until_ready(
        bottleneck_pallas_nhwc(x_nhwc, kparams, row_tile=8))
    relu_ref, out_ref = reference_forward_nhwc(x_nhwc, params)

    assert relu_out.shape == (N, H, W, inplanes)
    assert out.shape == (N, H, W, inplanes)
    assert out.dtype == jnp.float32
    # bf16 matmul inputs (f32 accumulation) and bf16 relu output -> bf16-level
    # tolerance vs the pure-f32 reference; pre-relu `out` uses the exact f32 x.
    assert jnp.allclose(out, out_ref, atol=5e-2, rtol=5e-2)
    assert jnp.allclose(relu_out.astype(jnp.float32), relu_ref, atol=5e-2, rtol=5e-2)
    assert jnp.allclose(relu_out.astype(jnp.float32), jnp.maximum(out, 0.0),
                        atol=2e-2, rtol=2e-2)

    # PyTorch-layout (NCHW) compatibility wrapper.
    x_nchw = jnp.transpose(x_nhwc, (0, 3, 1, 2))
    relu_nchw, out_nchw = jax.block_until_ready(bottleneck_pallas(x_nchw, kparams))
    assert relu_nchw.shape == (N, inplanes, H, W)
    assert jnp.allclose(out_nchw, jnp.transpose(out_ref, (0, 3, 1, 2)),
                        atol=5e-2, rtol=5e-2)
    assert jnp.allclose(relu_nchw.astype(jnp.float32),
                        jnp.transpose(relu_ref, (0, 3, 1, 2)),
                        atol=5e-2, rtol=5e-2)

    print("KERNEL_OK")
</pallas_src>

<mosaic_0001>
module attributes {stable_mosaic.version = 11 : i64} {
  func.func @_bottleneck_kernel(%arg0: i32, %arg1: i32, %arg2: memref<1x16x16x16xf32, #tpu.memory_space<vmem>>, %arg3: memref<16x128xbf16, #tpu.memory_space<vmem>>, %arg4: memref<9x128x128xbf16, #tpu.memory_space<vmem>>, %arg5: memref<128x16xbf16, #tpu.memory_space<vmem>>, %arg6: memref<3x128xf32, #tpu.memory_space<vmem>>, %arg7: memref<1x8x16x16xbf16, #tpu.memory_space<vmem>>, %arg8: memref<1x8x16x16xf32, #tpu.memory_space<vmem>>, %arg9: memref<10x18x128xf32, #tpu.memory_space<vmem>>) attributes {dimension_semantics = [#tpu.dimension_semantics<parallel>, #tpu.dimension_semantics<parallel>], iteration_bounds = array<i64: 2, 2>, scalar_prefetch = 0 : i64, scratch_operands = 1 : i64, tpu.core_type = #tpu.core_type<tc>, window_params = [{transform_indices = @transform_0, window_bounds = array<i64: 1, 16, 16, 16>}, {pipeline_mode = #tpu.pipeline_mode<synchronous>, transform_indices = @transform_1, window_bounds = array<i64: 16, 128>}, {pipeline_mode = #tpu.pipeline_mode<synchronous>, transform_indices = @transform_2, window_bounds = array<i64: 9, 128, 128>}, {pipeline_mode = #tpu.pipeline_mode<synchronous>, transform_indices = @transform_3, window_bounds = array<i64: 128, 16>}, {pipeline_mode = #tpu.pipeline_mode<synchronous>, transform_indices = @transform_4, window_bounds = array<i64: 3, 128>}, {transform_indices = @transform_5, window_bounds = array<i64: 1, 8, 16, 16>}, {transform_indices = @transform_6, window_bounds = array<i64: 1, 8, 16, 16>}]} {
    %c8_i32 = arith.constant 8 : i32
    %0 = arith.muli %arg1, %c8_i32 : i32
    %1 = tpu.assume_multiple %0, 8 : i32
    %c0 = arith.constant 0 : index
    %c0_0 = arith.constant 0 : index
    %2 = vector.load %arg6[%c0, %c0_0] : memref<3x128xf32, #tpu.memory_space<vmem>>, vector<1x128xf32>
    %c1 = arith.constant 1 : index
    %c0_1 = arith.constant 0 : index
    %3 = vector.load %arg6[%c1, %c0_1] : memref<3x128xf32, #tpu.memory_space<vmem>>, vector<1x128xf32>
    %c2 = arith.constant 2 : index
    %c0_2 = arith.constant 0 : index
    %4 = vector.load %arg6[%c2, %c0_2] : memref<3x128xf32, #tpu.memory_space<vmem>>, vector<1x16xf32>
    %cst = arith.constant 0.000000e+00 : f32
    %5 = vector.broadcast %cst : f32 to vector<10x1x128xf32>
    %c0_3 = arith.constant 0 : index
    %c0_4 = arith.constant 0 : index
    %c0_5 = arith.constant 0 : index
    %6 = vector.load %arg9[%c0_3, %c0_4, %c0_5] : memref<10x18x128xf32, #tpu.memory_space<vmem>>, vector<10x1x128xf32>
    tpu.vector_store %arg9[%c0_3, %c0_4, %c0_5], %5 {strides = array<i32>} : memref<10x18x128xf32, #tpu.memory_space<vmem>>, vector<10x1x128xf32>,
    %cst_6 = arith.constant 0.000000e+00 : f32
    %7 = vector.broadcast %cst_6 : f32 to vector<10x1x128xf32>
    %c0_7 = arith.constant 0 : index
    %c17 = arith.constant 17 : index
    %c0_8 = arith.constant 0 : index
    %8 = vector.load %arg9[%c0_7, %c17, %c0_8] : memref<10x18x128xf32, #tpu.memory_space<vmem>>, vector<10x1x128xf32>
    tpu.vector_store %arg9[%c0_7, %c17, %c0_8], %7 {strides = array<i32>} : memref<10x18x128xf32, #tpu.memory_space<vmem>>, vector<10x1x128xf32>,
    %c0_9 = arith.constant 0 : index
    %9 = arith.index_cast %1 : i32 to index
    %c0_10 = arith.constant 0 : index
    %c0_11 = arith.constant 0 : index
    %10 = vector.load %arg2[%c0_9, %9, %c0_10, %c0_11] : memref<1x16x16x16xf32, #tpu.memory_space<vmem>>, vector<1x8x16x16xf32>
    %11 = vector.shape_cast %10 : vector<1x8x16x16xf32> to vector<128x16xf32>
    %12 = arith.truncf %11 : vector<128x16xf32> to vector<128x16xbf16>
    %c0_12 = arith.constant 0 : index
    %c0_13 = arith.constant 0 : index
    %13 = vector.load %arg3[%c0_12, %c0_13] : memref<16x128xbf16, #tpu.memory_space<vmem>>, vector<16x128xbf16>
    %cst_14 = arith.constant dense<0.000000e+00> : vector<128x128xf32>
    %14 = tpu.matmul %12, %13, %cst_14 {dimension_numbers = #tpu.dot_dimension_numbers<[1], [0], [0], [1], [0, 0, 1, 1], [], []>} : vector<128x16xbf16>, vector<16x128xbf16>, vector<128x128xf32> -> vector<128x128xf32>
    %15 = vector.broadcast %2 : vector<1x128xf32> to vector<128x128xf32>
    %16 = arith.addf %14, %15 : vector<128x128xf32>
    %cst_15 = arith.constant 0.000000e+00 : f32
    %17 = vector.broadcast %cst_15 : f32 to vector<128x128xf32>
    %18 = arith.maximumf %16, %17 : vector<128x128xf32>
    %19 = vector.shape_cast %18 : vector<128x128xf32> to vector<8x16x128xf32>
    %c1_16 = arith.constant 1 : index
    %c1_17 = arith.constant 1 : index
    %c0_18 = arith.constant 0 : index
    %20 = vector.load %arg9[%c1_16, %c1_17, %c0_18] : memref<10x18x128xf32, #tpu.memory_space<vmem>>, vector<8x16x128xf32>
    tpu.vector_store %arg9[%c1_16, %c1_17, %c0_18], %19 {strides = array<i32>} : memref<10x18x128xf32, #tpu.memory_space<vmem>>, vector<8x16x128xf32>,
    %c0_i32 = arith.constant 0 : i32
    %21 = arith.cmpi sgt, %arg1, %c0_i32 : i32
    %22 = arith.extui %21 : i1 to i32
    %c0_i32_19 = arith.constant 0 : i32
    %23 = arith.cmpi ne, %22, %c0_i32_19 : i32
    scf.if %23 {
      %c1_i32_99 = arith.constant 1 : i32
      %121 = arith.subi %1, %c1_i32_99 : i32
      %c0_100 = arith.constant 0 : index
      %122 = arith.index_cast %121 : i32 to index
      %c0_101 = arith.constant 0 : index
      %c0_102 = arith.constant 0 : index
      %123 = vector.load %arg2[%c0_100, %122, %c0_101, %c0_102] : memref<1x16x16x16xf32, #tpu.memory_space<vmem>>, vector<1x1x16x16xf32>
      %124 = vector.shape_cast %123 : vector<1x1x16x16xf32> to vector<16x16xf32>
      %125 = arith.truncf %124 : vector<16x16xf32> to vector<16x16xbf16>
      %c0_103 = arith.constant 0 : index
      %c0_104 = arith.constant 0 : index
      %126 = vector.load %arg3[%c0_103, %c0_104] : memref<16x128xbf16, #tpu.memory_space<vmem>>, vector<16x128xbf16>
      %cst_105 = arith.constant dense<0.000000e+00> : vector<16x128xf32>
      %127 = tpu.matmul %125, %126, %cst_105 {dimension_numbers = #tpu.dot_dimension_numbers<[1], [0], [0], [1], [0, 0, 1, 1], [], []>} : vector<16x16xbf16>, vector<16x128xbf16>, vector<16x128xf32> -> vector<16x128xf32>
      %128 = vector.broadcast %2 : vector<1x128xf32> to vector<16x128xf32>
      %129 = arith.addf %127, %128 : vector<16x128xf32>
      %cst_106 = arith.constant 0.000000e+00 : f32
      %130 = vector.broadcast %cst_106 : f32 to vector<16x128xf32>
      %131 = arith.maximumf %129, %130 : vector<16x128xf32>
      %132 = vector.shape_cast %131 : vector<16x128xf32> to vector<1x16x128xf32>
      %c0_107 = arith.constant 0 : index
      %c1_108 = arith.constant 1 : index
      %c0_109 = arith.constant 0 : index
      %133 = vector.load %arg9[%c0_107, %c1_108, %c0_109] : memref<10x18x128xf32, #tpu.memory_space<vmem>>, vector<1x16x128xf32>
      tpu.vector_store %arg9[%c0_107, %c1_108, %c0_109], %132 {strides = array<i32>} : memref<10x18x128xf32, #tpu.memory_space<vmem>>, vector<1x16x128xf32>,
    } else {
    }
    %c0_i32_20 = arith.constant 0 : i32
    %24 = arith.cmpi eq, %arg1, %c0_i32_20 : i32
    %25 = arith.extui %24 : i1 to i32
    %c0_i32_21 = arith.constant 0 : i32
    %26 = arith.cmpi ne, %25, %c0_i32_21 : i32
    scf.if %26 {
      %cst_99 = arith.constant 0.000000e+00 : f32
      %121 = vector.broadcast %cst_99 : f32 to vector<1x18x128xf32>
      %c0_100 = arith.constant 0 : index
      %c0_101 = arith.constant 0 : index
      %c0_102 = arith.constant 0 : index
      %122 = vector.load %arg9[%c0_100, %c0_101, %c0_102] : memref<10x18x128xf32, #tpu.memory_space<vmem>>, vector<1x18x128xf32>
      tpu.vector_store %arg9[%c0_100, %c0_101, %c0_102], %121 {strides = array<i32>} : memref<10x18x128xf32, #tpu.memory_space<vmem>>, vector<1x18x128xf32>,
    } else {
    }
    %c1_i32 = arith.constant 1 : i32
    %27 = arith.cmpi slt, %arg1, %c1_i32 : i32
    %28 = arith.extui %27 : i1 to i32
    %c0_i32_22 = arith.constant 0 : i32
    %29 = arith.cmpi ne, %28, %c0_i32_22 : i32
    scf.if %29 {
      %c8_i32_99 = arith.constant 8 : i32
      %121 = arith.addi %1, %c8_i32_99 : i32
      %c0_100 = arith.constant 0 : index
      %122 = arith.index_cast %121 : i32 to index
      %c0_101 = arith.constant 0 : index
      %c0_102 = arith.constant 0 : index
      %123 = vector.load %arg2[%c0_100, %122, %c0_101, %c0_102] : memref<1x16x16x16xf32, #tpu.memory_space<vmem>>, vector<1x1x16x16xf32>
      %124 = vector.shape_cast %123 : vector<1x1x16x16xf32> to vector<16x16xf32>
      %125 = arith.truncf %124 : vector<16x16xf32> to vector<16x16xbf16>
      %c0_103 = arith.constant 0 : index
      %c0_104 = arith.constant 0 : index
      %126 = vector.load %arg3[%c0_103, %c0_104] : memref<16x128xbf16, #tpu.memory_space<vmem>>, vector<16x128xbf16>
      %cst_105 = arith.constant dense<0.000000e+00> : vector<16x128xf32>
      %127 = tpu.matmul %125, %126, %cst_105 {dimension_numbers = #tpu.dot_dimension_numbers<[1], [0], [0], [1], [0, 0, 1, 1], [], []>} : vector<16x16xbf16>, vector<16x128xbf16>, vector<16x128xf32> -> vector<16x128xf32>
      %128 = vector.broadcast %2 : vector<1x128xf32> to vector<16x128xf32>
      %129 = arith.addf %127, %128 : vector<16x128xf32>
      %cst_106 = arith.constant 0.000000e+00 : f32
      %130 = vector.broadcast %cst_106 : f32 to vector<16x128xf32>
      %131 = arith.maximumf %129, %130 : vector<16x128xf32>
      %132 = vector.shape_cast %131 : vector<16x128xf32> to vector<1x16x128xf32>
      %c9 = arith.constant 9 : index
      %c1_107 = arith.constant 1 : index
      %c0_108 = arith.constant 0 : index
      %133 = vector.load %arg9[%c9, %c1_107, %c0_108] : memref<10x18x128xf32, #tpu.memory_space<vmem>>, vector<1x16x128xf32>
      tpu.vector_store %arg9[%c9, %c1_107, %c0_108], %132 {strides = array<i32>} : memref<10x18x128xf32, #tpu.memory_space<vmem>>, vector<1x16x128xf32>,
    } else {
    }
    %c1_i32_23 = arith.constant 1 : i32
    %30 = arith.cmpi eq, %arg1, %c1_i32_23 : i32
    %31 = arith.extui %30 : i1 to i32
    %c0_i32_24 = arith.constant 0 : i32
    %32 = arith.cmpi ne, %31, %c0_i32_24 : i32
    scf.if %32 {
      %cst_99 = arith.constant 0.000000e+00 : f32
      %121 = vector.broadcast %cst_99 : f32 to vector<1x18x128xf32>
      %c9 = arith.constant 9 : index
      %c0_100 = arith.constant 0 : index
      %c0_101 = arith.constant 0 : index
      %122 = vector.load %arg9[%c9, %c0_100, %c0_101] : memref<10x18x128xf32, #tpu.memory_space<vmem>>, vector<1x18x128xf32>
      tpu.vector_store %arg9[%c9, %c0_100, %c0_101], %121 {strides = array<i32>} : memref<10x18x128xf32, #tpu.memory_space<vmem>>, vector<1x18x128xf32>,
    } else {
    }
    %c0_25 = arith.constant 0 : index
    %c0_26 = arith.constant 0 : index
    %c0_27 = arith.constant 0 : index
    %33 = vector.load %arg9[%c0_25, %c0_26, %c0_27] : memref<10x18x128xf32, #tpu.memory_space<vmem>>, vector<8x16x128xf32>
    %34 = arith.truncf %33 : vector<8x16x128xf32> to vector<8x16x128xbf16>
    %35 = vector.shape_cast %34 : vector<8x16x128xbf16> to vector<128x128xbf16>
    %c0_28 = arith.constant 0 : index
    %c0_29 = arith.constant 0 : index
    %c0_30 = arith.constant 0 : index
    %36 = vector.load %arg4[%c0_28, %c0_29, %c0_30] : memref<9x128x128xbf16, #tpu.memory_space<vmem>>, vector<1x128x128xbf16>
    %37 = vector.shape_cast %36 : vector<1x128x128xbf16> to vector<128x128xbf16>
    %cst_31 = arith.constant dense<0.000000e+00> : vector<128x128xf32>
    %38 = tpu.matmul %35, %37, %cst_31 {dimension_numbers = #tpu.dot_dimension_numbers<[1], [0], [0], [1], [0, 0, 1, 1], [], []>} : vector<128x128xbf16>, vector<128x128xbf16>, vector<128x128xf32> -> vector<128x128xf32>
    %c0_32 = arith.constant 0 : index
    %c1_33 = arith.constant 1 : index
    %c0_34 = arith.constant 0 : index
    %39 = vector.load %arg9[%c0_32, %c1_33, %c0_34] : memref<10x18x128xf32, #tpu.memory_space<vmem>>, vector<8x16x128xf32>
    %40 = arith.truncf %39 : vector<8x16x128xf32> to vector<8x16x128xbf16>
    %41 = vector.shape_cast %40 : vector<8x16x128xbf16> to vector<128x128xbf16>
    %c1_35 = arith.constant 1 : index
    %c0_36 = arith.constant 0 : index
    %c0_37 = arith.constant 0 : index
    %42 = vector.load %arg4[%c1_35, %c0_36, %c0_37] : memref<9x128x128xbf16, #tpu.memory_space<vmem>>, vector<1x128x128xbf16>
    %43 = vector.shape_cast %42 : vector<1x128x128xbf16> to vector<128x128xbf16>
    %cst_38 = arith.constant dense<0.000000e+00> : vector<128x128xf32>
    %44 = tpu.matmul %41, %43, %cst_38 {dimension_numbers = #tpu.dot_dimension_numbers<[1], [0], [0], [1], [0, 0, 1, 1], [], []>} : vector<128x128xbf16>, vector<128x128xbf16>, vector<128x128xf32> -> vector<128x128xf32>
    %45 = arith.addf %38, %44 : vector<128x128xf32>
    %c0_39 = arith.constant 0 : index
    %c2_40 = arith.constant 2 : index
    %c0_41 = arith.constant 0 : index
    %46 = vector.load %arg9[%c0_39, %c2_40, %c0_41] : memref<10x18x128xf32, #tpu.memory_space<vmem>>, vector<8x16x128xf32>
    %47 = arith.truncf %46 : vector<8x16x128xf32> to vector<8x16x128xbf16>
    %48 = vector.shape_cast %47 : vector<8x16x128xbf16> to vector<128x128xbf16>
    %c2_42 = arith.constant 2 : index
    %c0_43 = arith.constant 0 : index
    %c0_44 = arith.constant 0 : index
    %49 = vector.load %arg4[%c2_42, %c0_43, %c0_44] : memref<9x128x128xbf16, #tpu.memory_space<vmem>>, vector<1x128x128xbf16>
    %50 = vector.shape_cast %49 : vector<1x128x128xbf16> to vector<128x128xbf16>
    %cst_45 = arith.constant dense<0.000000e+00> : vector<128x128xf32>
    %51 = tpu.matmul %48, %50, %cst_45 {dimension_numbers = #tpu.dot_dimension_numbers<[1], [0], [0], [1], [0, 0, 1, 1], [], []>} : vector<128x128xbf16>, vector<128x128xbf16>, vector<128x128xf32> -> vector<128x128xf32>
    %52 = arith.addf %45, %51 : vector<128x128xf32>
    %c1_46 = arith.constant 1 : index
    %c0_47 = arith.constant 0 : index
    %c0_48 = arith.constant 0 : index
    %53 = vector.load %arg9[%c1_46, %c0_47, %c0_48] : memref<10x18x128xf32, #tpu.memory_space<vmem>>, vector<8x16x128xf32>
    %54 = arith.truncf %53 : vector<8x16x128xf32> to vector<8x16x128xbf16>
    %55 = vector.shape_cast %54 : vector<8x16x128xbf16> to vector<128x128xbf16>
    %c3 = arith.constant 3 : index
    %c0_49 = arith.constant 0 : index
    %c0_50 = arith.constant 0 : index
    %56 = vector.load %arg4[%c3, %c0_49, %c0_50] : memref<9x128x128xbf16, #tpu.memory_space<vmem>>, vector<1x128x128xbf16>
    %57 = vector.shape_cast %56 : vector<1x128x128xbf16> to vector<128x128xbf16>
    %cst_51 = arith.constant dense<0.000000e+00> : vector<128x128xf32>
    %58 = tpu.matmul %55, %57, %cst_51 {dimension_numbers = #tpu.dot_dimension_numbers<[1], [0], [0], [1], [0, 0, 1, 1], [], []>} : vector<128x128xbf16>, vector<128x128xbf16>, vector<128x128xf32> -> vector<128x128xf32>
    %59 = arith.addf %52, %58 : vector<128x128xf32>
    %c1_52 = arith.constant 1 : index
    %c1_53 = arith.constant 1 : index
    %c0_54 = arith.constant 0 : index
    %60 = vector.load %arg9[%c1_52, %c1_53, %c0_54] : memref<10x18x128xf32, #tpu.memory_space<vmem>>, vector<8x16x128xf32>
    %61 = arith.truncf %60 : vector<8x16x128xf32> to vector<8x16x128xbf16>
    %62 = vector.shape_cast %61 : vector<8x16x128xbf16> to vector<128x128xbf16>
    %c4 = arith.constant 4 : index
    %c0_55 = arith.constant 0 : index
    %c0_56 = arith.constant 0 : index
    %63 = vector.load %arg4[%c4, %c0_55, %c0_56] : memref<9x128x128xbf16, #tpu.memory_space<vmem>>, vector<1x128x128xbf16>
    %64 = vector.shape_cast %63 : vector<1x128x128xbf16> to vector<128x128xbf16>
    %cst_57 = arith.constant dense<0.000000e+00> : vector<128x128xf32>
    %65 = tpu.matmul %62, %64, %cst_57 {dimension_numbers = #tpu.dot_dimension_numbers<[1], [0], [0], [1], [0, 0, 1, 1], [], []>} : vector<128x128xbf16>, vector<128x128xbf16>, vector<128x128xf32> -> vector<128x128xf32>
    %66 = arith.addf %59, %65 : vector<128x128xf32>
    %c1_58 = arith.constant 1 : index
    %c2_59 = arith.constant 2 : index
    %c0_60 = arith.constant 0 : index
    %67 = vector.load %arg9[%c1_58, %c2_59, %c0_60] : memref<10x18x128xf32, #tpu.memory_space<vmem>>, vector<8x16x128xf32>
    %68 = arith.truncf %67 : vector<8x16x128xf32> to vector<8x16x128xbf16>
    %69 = vector.shape_cast %68 : vector<8x16x128xbf16> to vector<128x128xbf16>
    %c5 = arith.constant 5 : index
    %c0_61 = arith.constant 0 : index
    %c0_62 = arith.constant 0 : index
    %70 = vector.load %arg4[%c5, %c0_61, %c0_62] : memref<9x128x128xbf16, #tpu.memory_space<vmem>>, vector<1x128x128xbf16>
    %71 = vector.shape_cast %70 : vector<1x128x128xbf16> to vector<128x128xbf16>
    %cst_63 = arith.constant dense<0.000000e+00> : vector<128x128xf32>
    %72 = tpu.matmul %69, %71, %cst_63 {dimension_numbers = #tpu.dot_dimension_numbers<[1], [0], [0], [1], [0, 0, 1, 1], [], []>} : vector<128x128xbf16>, vector<128x128xbf16>, vector<128x128xf32> -> vector<128x128xf32>
    %73 = arith.addf %66, %72 : vector<128x128xf32>
    %c2_64 = arith.constant 2 : index
    %c0_65 = arith.constant 0 : index
    %c0_66 = arith.constant 0 : index
    %74 = vector.load %arg9[%c2_64, %c0_65, %c0_66] : memref<10x18x128xf32, #tpu.memory_space<vmem>>, vector<8x16x128xf32>
    %75 = arith.truncf %74 : vector<8x16x128xf32> to vector<8x16x128xbf16>
    %76 = vector.shape_cast %75 : vector<8x16x128xbf16> to vector<128x128xbf16>
    %c6 = arith.constant 6 : index
    %c0_67 = arith.constant 0 : index
    %c0_68 = arith.constant 0 : index
    %77 = vector.load %arg4[%c6, %c0_67, %c0_68] : memref<9x128x128xbf16, #tpu.memory_space<vmem>>, vector<1x128x128xbf16>
    %78 = vector.shape_cast %77 : vector<1x128x128xbf16> to vector<128x128xbf16>
    %cst_69 = arith.constant dense<0.000000e+00> : vector<128x128xf32>
    %79 = tpu.matmul %76, %78, %cst_69 {dimension_numbers = #tpu.dot_dimension_numbers<[1], [0], [0], [1], [0, 0, 1, 1], [], []>} : vector<128x128xbf16>, vector<128x128xbf16>, vector<128x128xf32> -> vector<128x128xf32>
    %80 = arith.addf %73, %79 : vector<128x128xf32>
    %c2_70 = arith.constant 2 : index
    %c1_71 = arith.constant 1 : index
    %c0_72 = arith.constant 0 : index
    %81 = vector.load %arg9[%c2_70, %c1_71, %c0_72] : memref<10x18x128xf32, #tpu.memory_space<vmem>>, vector<8x16x128xf32>
    %82 = arith.truncf %81 : vector<8x16x128xf32> to vector<8x16x128xbf16>
    %83 = vector.shape_cast %82 : vector<8x16x128xbf16> to vector<128x128xbf16>
    %c7 = arith.constant 7 : index
    %c0_73 = arith.constant 0 : index
    %c0_74 = arith.constant 0 : index
    %84 = vector.load %arg4[%c7, %c0_73, %c0_74] : memref<9x128x128xbf16, #tpu.memory_space<vmem>>, vector<1x128x128xbf16>
    %85 = vector.shape_cast %84 : vector<1x128x128xbf16> to vector<128x128xbf16>
    %cst_75 = arith.constant dense<0.000000e+00> : vector<128x128xf32>
    %86 = tpu.matmul %83, %85, %cst_75 {dimension_numbers = #tpu.dot_dimension_numbers<[1], [0], [0], [1], [0, 0, 1, 1], [], []>} : vector<128x128xbf16>, vector<128x128xbf16>, vector<128x128xf32> -> vector<128x128xf32>
    %87 = arith.addf %80, %86 : vector<128x128xf32>
    %c2_76 = arith.constant 2 : index
    %c2_77 = arith.constant 2 : index
    %c0_78 = arith.constant 0 : index
    %88 = vector.load %arg9[%c2_76, %c2_77, %c0_78] : memref<10x18x128xf32, #tpu.memory_space<vmem>>, vector<8x16x128xf32>
    %89 = arith.truncf %88 : vector<8x16x128xf32> to vector<8x16x128xbf16>
    %90 = vector.shape_cast %89 : vector<8x16x128xbf16> to vector<128x128xbf16>
    %c8 = arith.constant 8 : index
    %c0_79 = arith.constant 0 : index
    %c0_80 = arith.constant 0 : index
    %91 = vector.load %arg4[%c8, %c0_79, %c0_80] : memref<9x128x128xbf16, #tpu.memory_space<vmem>>, vector<1x128x128xbf16>
    %92 = vector.shape_cast %91 : vector<1x128x128xbf16> to vector<128x128xbf16>
    %cst_81 = arith.constant dense<0.000000e+00> : vector<128x128xf32>
    %93 = tpu.matmul %90, %92, %cst_81 {dimension_numbers = #tpu.dot_dimension_numbers<[1], [0], [0], [1], [0, 0, 1, 1], [], []>} : vector<128x128xbf16>, vector<128x128xbf16>, vector<128x128xf32> -> vector<128x128xf32>
    %94 = arith.addf %87, %93 : vector<128x128xf32>
    %95 = vector.broadcast %3 : vector<1x128xf32> to vector<128x128xf32>
    %96 = arith.addf %94, %95 : vector<128x128xf32>
    %cst_82 = arith.constant 0.000000e+00 : f32
    %97 = vector.broadcast %cst_82 : f32 to vector<128x128xf32>
    %98 = arith.maximumf %96, %97 : vector<128x128xf32>
    %99 = arith.truncf %98 : vector<128x128xf32> to vector<128x128xbf16>
    %c0_83 = arith.constant 0 : index
    %c0_84 = arith.constant 0 : index
    %100 = vector.load %arg5[%c0_83, %c0_84] : memref<128x16xbf16, #tpu.memory_space<vmem>>, vector<128x16xbf16>
    %cst_85 = arith.constant dense<0.000000e+00> : vector<128x16xf32>
    %101 = tpu.matmul %99, %100, %cst_85 {dimension_numbers = #tpu.dot_dimension_numbers<[1], [0], [0], [1], [0, 0, 1, 1], [], []>} : vector<128x128xbf16>, vector<128x16xbf16>, vector<128x16xf32> -> vector<128x16xf32>
    %102 = vector.broadcast %4 : vector<1x16xf32> to vector<128x16xf32>
    %103 = arith.addf %101, %102 : vector<128x16xf32>
    %cst_86 = arith.constant 0.000000e+00 : f32
    %104 = vector.broadcast %cst_86 : f32 to vector<128x16xf32>
    %105 = arith.maximumf %103, %104 : vector<128x16xf32>
    %c0_87 = arith.constant 0 : index
    %106 = arith.index_cast %1 : i32 to index
    %c0_88 = arith.constant 0 : index
    %c0_89 = arith.constant 0 : index
    %107 = vector.load %arg2[%c0_87, %106, %c0_88, %c0_89] : memref<1x16x16x16xf32, #tpu.memory_space<vmem>>, vector<1x8x16x16xf32>
    %108 = vector.shape_cast %107 : vector<1x8x16x16xf32> to vector<128x16xf32>
    %109 = arith.addf %105, %108 : vector<128x16xf32>
    %110 = vector.shape_cast %109 : vector<128x16xf32> to vector<8x16x16xf32>
    %c0_90 = arith.constant 0 : index
    %c0_91 = arith.constant 0 : index
    %c0_92 = arith.constant 0 : index
    %c0_93 = arith.constant 0 : index
    %111 = vector.load %arg8[%c0_90, %c0_91, %c0_92, %c0_93] : memref<1x8x16x16xf32, #tpu.memory_space<vmem>>, vector<1x8x16x16xf32>
    %112 = vector.shape_cast %111 : vector<1x8x16x16xf32> to vector<8x16x16xf32>
    %113 = vector.shape_cast %110 : vector<8x16x16xf32> to vector<1x8x16x16xf32>
    tpu.vector_store %arg8[%c0_90, %c0_91, %c0_92, %c0_93], %113 {strides = array<i32>} : memref<1x8x16x16xf32, #tpu.memory_space<vmem>>, vector<1x8x16x16xf32>,
    %cst_94 = arith.constant 0.000000e+00 : f32
    %114 = vector.broadcast %cst_94 : f32 to vector<128x16xf32>
    %115 = arith.maximumf %109, %114 : vector<128x16xf32>
    %116 = vector.shape_cast %115 : vector<128x16xf32> to vector<8x16x16xf32>
    %117 = arith.truncf %116 : vector<8x16x16xf32> to vector<8x16x16xbf16>
    %c0_95 = arith.constant 0 : index
    %c0_96 = arith.constant 0 : index
    %c0_97 = arith.constant 0 : index
    %c0_98 = arith.constant 0 : index
    %118 = vector.load %arg7[%c0_95, %c0_96, %c0_97, %c0_98] : memref<1x8x16x16xbf16, #tpu.memory_space<vmem>>, vector<1x8x16x16xbf16>
    %119 = vector.shape_cast %118 : vector<1x8x16x16xbf16> to vector<8x16x16xbf16>
    %120 = vector.shape_cast %117 : vector<8x16x16xbf16> to vector<1x8x16x16xbf16>
    tpu.vector_store %arg7[%c0_95, %c0_96, %c0_97, %c0_98], %120 {strides = array<i32>} : memref<1x8x16x16xbf16, #tpu.memory_space<vmem>>, vector<1x8x16x16xbf16>,
    return
  }
  func.func @transform_0(%arg0: i32, %arg1: i32) -> (i32, i32, i32, i32) {
    %c0_i32 = arith.constant 0 : i32
    %c0_i32_0 = arith.constant 0 : i32
    %c0_i32_1 = arith.constant 0 : i32
    %c0_i32_2 = arith.constant 0 : i32
    return %arg0, %c0_i32, %c0_i32_0, %c0_i32_1 : i32, i32, i32, i32
  }
  func.func @transform_1(%arg0: i32, %arg1: i32) -> (i32, i32) {
    %c0_i32 = arith.constant 0 : i32
    %c0_i32_0 = arith.constant 0 : i32
    %c0_i32_1 = arith.constant 0 : i32
    return %c0_i32, %c0_i32_0 : i32, i32
  }
  func.func @transform_2(%arg0: i32, %arg1: i32) -> (i32, i32, i32) {
    %c0_i32 = arith.constant 0 : i32
    %c0_i32_0 = arith.constant 0 : i32
    %c0_i32_1 = arith.constant 0 : i32
    %c0_i32_2 = arith.constant 0 : i32
    return %c0_i32, %c0_i32_0, %c0_i32_1 : i32, i32, i32
  }
  func.func @transform_3(%arg0: i32, %arg1: i32) -> (i32, i32) {
    %c0_i32 = arith.constant 0 : i32
    %c0_i32_0 = arith.constant 0 : i32
    %c0_i32_1 = arith.constant 0 : i32
    return %c0_i32, %c0_i32_0 : i32, i32
  }
  func.func @transform_4(%arg0: i32, %arg1: i32) -> (i32, i32) {
    %c0_i32 = arith.constant 0 : i32
    %c0_i32_0 = arith.constant 0 : i32
    %c0_i32_1 = arith.constant 0 : i32
    return %c0_i32, %c0_i32_0 : i32, i32
  }
  func.func @transform_5(%arg0: i32, %arg1: i32) -> (i32, i32, i32, i32) {
    %c0_i32 = arith.constant 0 : i32
    %c0_i32_0 = arith.constant 0 : i32
    %c0_i32_1 = arith.constant 0 : i32
    return %arg0, %arg1, %c0_i32, %c0_i32_0 : i32, i32, i32, i32
  }
  func.func @transform_6(%arg0: i32, %arg1: i32) -> (i32, i32, i32, i32) {
    %c0_i32 = arith.constant 0 : i32
    %c0_i32_0 = arith.constant 0 : i32
    %c0_i32_1 = arith.constant 0 : i32
    return %arg0, %arg1, %c0_i32, %c0_i32_0 : i32, i32, i32, i32
  }
}

</mosaic_0001>

<bundles_post_ra>
// kernel: tpu_custom_call.1
= control target key start
LH: loop header
LB: loop body
LE: loop exit
PB: predicated region body
PF: predicated region fallthrough
CT: control target
= control target key end

     0   :  { %s4436_s0 = inlined_call_operand.hbm [shape: f32[2,16,16,16], index: 0, kind: input, shape index: {}]   ;;  %s4437_s1 = inlined_call_operand.vmem [shape: bf16[16,128], index: 1, kind: input, shape index: {}]   ;;  %s4438_s2 = inlined_call_operand.hbm [shape: bf16[9,128,128], index: 2, kind: input, shape index: {}]   ;;  %s4439_s3 = inlined_call_operand.vmem [shape: bf16[128,16], index: 3, kind: input, shape index: {}]   ;;  %s4440_s4 = inlined_call_operand.vmem [shape: f32[3,128], index: 4, kind: input, shape index: {}]   ;;  %s4441_s5 = inlined_call_operand.hbm [shape: bf16[2,16,16,16], index: 5, kind: output, shape index: {0}]   ;;  %s4442_s6 = inlined_call_operand.hbm [shape: f32[2,16,16,16], index: 6, kind: output, shape index: {1}]  }
   0x1   :  { %4453 = sst [smem:[#allocation22_spill]] %s4436_s0 }
   0x2   :  { %4454 = sst [smem:[#allocation23_spill]] %s4438_s2 }
   0x3   :  { %4455 = sst [smem:[#allocation24_spill]] %s4439_s3 }
   0x4   :  { %4456 = sst [smem:[#allocation25_spill]] %s4441_s5 }
   0x5   :  { %4457 = sst [smem:[#allocation26_spill]] %s4442_s6 }
   0x6   :  { %12 = vsyncpa [#allocation4], 0 }
   0x7   :  { %14 = vsyncpa [#allocation4 + $0x1], 0 }
   0x8   :  { %15 = vsyncpa [#allocation7], 0 }
   0x9   :  { %16 = vsyncpa [#allocation5], 0 }
   0xa   :  { %18 = vsyncpa [#allocation5 + $0x1], 0 }
   0xb   :  { %19 = vsyncpa [#allocation10], 0 }
   0xc   :  { %21 = vsyncpa [#allocation10 + $0x1], 0  ;;  %s3773_s21 = smov 0   ;;  %s3775_s22 = smov 0  }
   0xd   :  { %s3777_s23 = smov 0   ;;  %s3779_s24 = smov 0  }
   0xe   :  { %s3781_s25 = smov 0   ;;  %s3783_s26 = smov 0  }
   0xf   :  { %s3785_s27 = smov 0   ;;  %s3787_s28 = smov 0  }
  0x10   :  { %s3789_s29 = smov 0   ;;  %s3791_s30 = smov 0  }
  0x11   :  { %s3793_s7 = smov 0  }
  0x12 LB: > { %4458 = sst [smem:[#allocation15_spill]] %s3684_s21  ;;  %s2890_s8 = sadd.s32 4294967295, %s3724_s7   ;;  %s3724_s7 = sphi %s3793_s7, %s27_s7   ;;  %s3720_s30 = sphi %s3791_s30, %s4491_s30   ;;  %s3716_s29 = sphi %s3789_s29, %s4482_s29   ;;  %s3712_s28 = sphi %s3787_s28, %s4490_s28   ;;  %s3708_s27 = sphi %s3785_s27, %s4481_s27   ;;  %s3704_s26 = sphi %s3783_s26, %s4489_s26   ;;  %s3700_s25 = sphi %s3781_s25, %s4488_s25   ;;  %s3696_s24 = sphi %s3779_s24, %s4487_s24   ;;  %s3692_s23 = sphi %s3777_s23, %s4486_s23   ;;  %s3688_s22 = sphi %s3775_s22, %s4485_s22   ;;  %s3684_s21 = sphi %s3773_s21, %s4484_s21  }
  0x13   : > { %4459 = sst [smem:[#allocation16_spill]] %s3712_s28  ;;  %s2891_s9 = sadd.s32 4294967294, %s3724_s7  }
  0x14   : > { %4460 = sst [smem:[#allocation17_spill]] %s3716_s29  ;;  %p59_p0 = scmp.ne.s32.totalorder %s3700_s25, %s3696_s24 }
  0x15   : > { %p3829_p1 = scmp.eq.s32.totalorder %s2890_s8, 0  ;;  %p168_p2 = scmp.ne.s32.totalorder %s3692_s23, %s3688_s22 }
  0x16   : > { %p169_p3 = scmp.eq.s32.totalorder %s2890_s8, 3  ;;  %p174_p5 = scmp.ne.s32.totalorder %s3688_s22, %s3684_s21 }
  0x17   : > { %p3837_p4 = por %p3829_p1, %p59_p0  ;;  %p175_p7 = scmp.eq.s32.totalorder %s2891_s9, 3 }
  0x18   : > { %p3843_p6 = por %p169_p3, %p168_p2  ;;  %p2892_p8 = scmp.ge.s32.totalorder %s3724_s7, 1 }
  0x19   : > { %p210_p9 = scmp.lt.s32.totalorder %s3724_s7, 5  ;;  %p3849_p10 = por %p175_p7, %p174_p5 }
  0x1a   : > { %s4463_s12 = scalar_select %p3843_p6, 1, 0 }
  0x1b   : > { %s4465_s13 = scalar_select %p3849_p10, 1, 0 }
  0x1c   : > { %4464 = sst [smem:[#allocation18_spill]] %s4463_s12  ;;  %p3853_p11 = pnand %p2892_p8, %p210_p9 }
  0x1d   : > { %4466 = sst [smem:[#allocation19_spill]] %s4465_s13  ;;  %s3726_s18 = smov [#allocation6]  }
  0x1e   : > { %s4468_s2 = sld [smem:[#allocation23_spill]]  ;;  %p3386_p12 = pneg %p3853_p11 }
  0x1f   : > { %s226_s19 = sshll.u32 %s3726_s18, 4  ;;  %s3727_s20 = smov 64   ;;  %s227_s19 = int_to_ptr.vmem [resolvable:$true] %s226_s19 }
  0x20   : > { %p3387_p13 = pnand %p3386_p12, %p3829_p1  ;;  %s3728_s24 = smov 4  }
  0x21   : > { %s36_s8 = sadd.s32 1, %s3716_s29  ;;  %s39_s9 = sadd.s32 1, %s3720_s30 }
  0x22   : > { %p37_p0 = scmp.ge.s32.totalorder %s36_s8, 2  ;;  %s46_s15 = sadd.s32 1, %s3704_s26 }
  0x23   : > { %p53_p2 = scmp.ne.s32.totalorder %s3704_s26, %s3700_s25  ;;  %p54_p3 = scmp.eq.s32.totalorder %s3724_s7, 0 }
  0x24   : > { %s224_s17 = sshll.u32 %s4468_s2, 4  ;;  %s4493_s8 = smov (%p37_p0, %s36_s8), 0  ;;  %s225_s17 = int_to_ptr.hbm [resolvable:$true] %s224_s17 }
  0x25   : > { %3389 = dma.hbm_to_vmem [thread:$0]  (!%p3387_p13), %s225_s17, 9216, %s227_s19, [#allocation7], %s3727_s20, %s3727_s20, %s3728_s24  }
  0x26   : > { %4469 = sst [smem:[#allocation20_spill]] %s4493_s8  ;;  %s4495_s9 = smov (!%p37_p0, %s39_s9), %s3720_s30 }
  0x27   : > { %p3873_p5 = por %p54_p3, %p53_p2  ;;  %s154_s18 = ssub.s32 %s3716_s29, %s4493_s8 }
  0x28   : > { %p41_p7 = scmp.ge.s32.totalorder %s4495_s9, 2  ;;  %s158_s17 = sadd.s32 1, %s3692_s23 }
  0x29   : > { %p3402_p8 = scmp.lt.s32.totalorder %s3724_s7, 4  ;;  %s246_s19 = sand.u32 1, %s3704_s26  }
  0x2a   : > { %s4497_s9 = smov (%p41_p7, %s4495_s9), 0  ;;  %s2895_s20 = sshll.u32 %s246_s19, 8 }
  0x2b   : > { %4471 = sst [smem:[#allocation21_spill]] %s4497_s9  ;;  %s43_s24 = ssub.s32 %s3720_s30, %s4497_s9 }
  0x2c   : > { %p44_p9 = scmp.eq.s32.totalorder %s43_s24, 0  ;;  %s155_s2 = sor.u32 %s154_s18, %s43_s24 }
  0x2d   : > { %p156_p12 = scmp.eq.s32.totalorder %s155_s2, 0  ;;  %s3269_s13 = sshll.u32 %s3720_s30, 8 }
  0x2e   : > { %s3888_s21 = scalar_select %p44_p9, %s3704_s26, %s46_s15  }
  0x2f   : > { %s3891_s12 = scalar_select %p156_p12, %s3692_s23, %s158_s17  }
  0x30   : > { %s4472_s0 = sld [smem:[#allocation22_spill]]  ;;  %s250_s6 = scalar_lea.vmem [#allocation3], %s2895_s20 }
  0x31   : > { %s258_s28 = sshll.u32 %s250_s6, 4  ;;  %p3391_p13 = pnand %p3402_p8, %p3873_p5  ;;  %s259_s28 = int_to_ptr.vmem [resolvable:$true] %s258_s28 }
  0x32   : > { %s247_s9 = scalar_lea.sflag [#allocation4], %s246_s19  ;;  %s3729_s18 = smov 128  }
  0x33   : > { %s3730_s2 = smov 8   ;;  %s272_s15 = sand.u32 (!%p3853_p11), 1, %s3700_s25  }
  0x34   : > { %270 = sbr.rel (%p3853_p11) target bundleno = 1191 (0x4a7), region = 40  ;;  %s3903_s29 = sshll.u32 (!%p3853_p11), %s272_s15, 8 }
  0x35   : > { %s273_s6 = scalar_lea.sflag (!%p3853_p11), [#allocation4], %s272_s15 }
  0x36   : > { %s255_s5 = scalar_lea.hbm %s4472_s0, %s3269_s13 }
  0x37   : > { %s256_s3 = sshll.u32 %s255_s5, 4  ;;  %s276_s5 = scalar_lea.vmem (!%p3853_p11), [#allocation3], %s3903_s29  ;;  %s257_s3 = int_to_ptr.hbm [resolvable:$true] %s256_s3 }
  0x38   : > { %3393 = dma.hbm_to_vmem [thread:$0]  (!%p3391_p13), %s257_s3, 4096, %s259_s28, %s247_s9, %s3729_s18, %s3729_s18, %s3730_s2  }
  0x39   : > { %3667 = dma.done.wait (%p3837_p4), %s273_s6, 4096  }
  0x3a   : > { %3669 = vsyncadd (%p3837_p4), %s273_s6, 4294963200 }
  0x3b   : > { %3671 = dma.done.wait (%p3829_p1), [#allocation7], 9216  }
  0x3c   : > { %3673 = vsyncadd (%p3829_p1), [#allocation7], 4294958080  ;;  %s3915_s3 = sand.u32 1, %s3688_s22   ;;  %s2903_s28 = sshll.u32 %s3708_s27, 3  ;;  %v3731_v0 = vmov 0.0   ;;  %v3271_v3 = vld [vmem:[%s4437_s1] sm:$0xff] }
  0x3d   : > { %323 = vst [vmem:[#allocation2] sm:$0x1] %v3731_v0  ;;  %s2901_s13 = sshll.u32 %s3915_s3, 6  ;;  %s2902_s11 = sshll.u32 %s3915_s3, 7  ;;  %v3928_v1 = vld [vmem:[%s4440_s4 + $0x1] sm:$0x1]  ;;  %410 = vmatpush.bf16.msra.mxu0 %v3271_v3  ;;  %3357 = vmatpush.bf16.msra.mxu1 %v3271_v3 }
  0x3e   : > { %324 = vst [vmem:[#allocation2 + $0x18] sm:$0x1] %v3731_v0  ;;  %s3270_s14 = sshll.u32 %s3708_s27, 7  ;;  %v3933_v2 = vld [vmem:[%s4440_s4 + $0x2] sm:$0x1]  ;;  %vm378_vm0 = vcmask 130048   ;;  %3358 = vmatpush.bf16.msra.mxu2 %v3271_v3  ;;  %3359 = vmatpush.bf16.msra.mxu3 %v3271_v3 }
  0x3f   : > { %325 = vst [vmem:[#allocation2 + $0x30] sm:$0x1] %v3731_v0  ;;  %s3923_s10 = scalar_lea.vmem %s276_s5, %s3270_s14 [#allocation3]  ;;  %v3965_v28 = vld [vmem:[%s4440_s4] ss:$0 sm:$0xff]  ;;  %s3985_s2 = scalar_lea.vmem [#allocation8], %s2901_s13 }
  0x40   : > { %326 = vst [vmem:[#allocation2 + $0x48] sm:$0x1] %v3731_v0  ;;  %v345_v4 = vld [vmem:[%s3923_s10] sm:$0xff]  ;;  %v346_v5 = vld [vmem:[%s3923_s10 + $0x8] sm:$0xff]  ;;  %v347_v16 = vld [vmem:[%s3923_s10 + $0x10] sm:$0xff]  ;;  %s3989_s15 = scalar_lea.vmem [#allocation9], %s2902_s11 }
  0x41   : > { %327 = vst [vmem:[#allocation2 + $0x60] sm:$0x1] %v3731_v0  ;;  %v361_v6 = vpack.c.bf16 %v346_v5, %v345_v4  ;;  %v349_v7 = vld [vmem:[%s3923_s10 + $0x20] sm:$0xff]  ;;  %v350_v8 = vld [vmem:[%s3923_s10 + $0x28] sm:$0xff]  ;;  %v348_v17 = vld [vmem:[%s3923_s10 + $0x18] sm:$0xff]  ;;  %p2917_p1 = scmp.le.s32.totalorder %s3708_s27, 0 }
  0x42   : > { %328 = vst [vmem:[#allocation2 + $0x78] sm:$0x1] %v3731_v0  ;;  %v353_v9 = vld [vmem:[%s3923_s10 + $0x40] sm:$0xff]  ;;  %v363_v10 = vpack.c.bf16 %v350_v8, %v349_v7  ;;  %v354_v11 = vld [vmem:[%s3923_s10 + $0x48] sm:$0xff]  ;;  %v351_v18 = vld [vmem:[%s3923_s10 + $0x30] sm:$0xff]  ;;  %v362_v24 = vpack.c.bf16 %v348_v17, %v347_v16  ;;  %s2918_s8 = sadd.s32 (!%p2917_p1), 4294967295, %s2903_s28 }
  0x43   : > { %329 = vst [vmem:[#allocation2 + $0x90] sm:$0x1] %v3731_v0  ;;  %v357_v12 = vld [vmem:[%s3923_s10 + $0x60] sm:$0xff]  ;;  %v358_v13 = vld [vmem:[%s3923_s10 + $0x68] sm:$0xff]  ;;  %v365_v14 = vpack.c.bf16 %v354_v11, %v353_v9  ;;  %2909 = vmatmul.msk.bf16.vlgmr.msra.gmra.mxu0 %vm378_vm0, %v361_v6  ;;  %v352_v19 = vld [vmem:[%s3923_s10 + $0x38] sm:$0xff]  ;;  %s2919_s9 = sshll.u32 (!%p2917_p1), %s2918_s8, 4 }
  0x44   : > { %330 = vst [vmem:[#allocation2 + $0xa8] sm:$0x1] %v3731_v0  ;;  %v367_v15 = vpack.c.bf16 %v358_v13, %v357_v12  ;;  %2911 = vmatmul.msk.bf16.vlgmr.msra.gmra.mxu1 %vm378_vm0, %v363_v10  ;;  %v355_v20 = vld [vmem:[%s3923_s10 + $0x50] sm:$0xff]  ;;  %v356_v21 = vld [vmem:[%s3923_s10 + $0x58] sm:$0xff]  ;;  %v364_v25 = vpack.c.bf16 %v352_v19, %v351_v18  ;;  %s491_s16 = scalar_lea.vmem (!%p2917_p1), %s276_s5, %s2919_s9 [#allocation3] }
  0x45   : > { %331 = vst [vmem:[#allocation2 + $0xc0] sm:$0x1] %v3731_v0  ;;  %2913 = vmatmul.msk.bf16.vlgmr.msra.gmra.mxu2 %vm378_vm0, %v365_v14  ;;  %v359_v22 = vld [vmem:[%s3923_s10 + $0x70] sm:$0xff]  ;;  %v360_v23 = vld [vmem:[%s3923_s10 + $0x78] sm:$0xff]  ;;  %v366_v26 = vpack.c.bf16 %v356_v21, %v355_v20 }
  0x46   : > { %332 = vst [vmem:[#allocation2 + $0xd8] sm:$0x1] %v3731_v0  ;;  %2915 = vmatmul.msk.bf16.vlgmr.msra.gmra.mxu3 %vm378_vm0, %v367_v15  ;;  %v368_v27 = vpack.c.bf16 %v360_v23, %v359_v22 }
  0x47   : > { %333 = vst [vmem:[#allocation2 + $0x11] sm:$0x1] %v3731_v0 }
  0x48   : > { %334 = vst [vmem:[#allocation2 + $0x29] sm:$0x1] %v3731_v0 }
  0x49   : > { %335 = vst [vmem:[#allocation2 + $0x41] sm:$0x1] %v3731_v0 }
  0x4a   : > { %336 = vst [vmem:[#allocation2 + $0x59] sm:$0x1] %v3731_v0 }
  0x4b   : > { %337 = vst [vmem:[#allocation2 + $0x71] sm:$0x1] %v3731_v0 }
  0x4c   : > { %338 = vst [vmem:[#allocation2 + $0x89] sm:$0x1] %v3731_v0 }
  0x4d   : > { %339 = vst [vmem:[#allocation2 + $0xa1] sm:$0x1] %v3731_v0 }
  0x4e   : > { %340 = vst [vmem:[#allocation2 + $0xb9] sm:$0x1] %v3731_v0 }
  0x4f   : > { %341 = vst [vmem:[#allocation2 + $0xd1] sm:$0x1] %v3731_v0 }
  0x50   : > { %342 = vst [vmem:[#allocation2 + $0xe9] sm:$0x1] %v3731_v0 }
  0x53   : > { %2910 = vmatmul.msk.bf16.gmra.mxu0 %vm378_vm0, %v362_v24 }
  0x54   : > { %2912 = vmatmul.msk.bf16.gmra.mxu1 %vm378_vm0, %v364_v25 }
  0x55   : > { %2914 = vmatmul.msk.bf16.gmra.mxu2 %vm378_vm0, %v366_v26 }
  0x56   : > { %2916 = vmatmul.msk.bf16.gmra.mxu3 %vm378_vm0, %v368_v27 }
  0xc0   : > { %v412_v29 = vpop.f32.mrf.mxu0 }
  0xc1   : > { %v422_v30 = vpop.f32.mrf.mxu1  ;;  %v413_v31 = vadd.f32 %v3965_v28, %v412_v29 }
  0xc2   : > { %v423_v32 = vadd.f32 %v3965_v28, %v422_v30 }
  0xc3   : > { %v452_v33 = vmax.f32 %v413_v31, 0.0 }
  0xc4   : > { %v456_v34 = vmax.f32 %v423_v32, 0.0 }
  0xc5   : > { %469 = vst [vmem:[#allocation2 + $0x19] sm:$0xff] %v452_v33 }
  0xc6   : > { %473 = vst [vmem:[#allocation2 + $0x49] sm:$0xff] %v456_v34 }
  0xc8   : > { %v432_v35 = vpop.f32.mrf.mxu2  ;;  %v414_v39 = vpop.f32.mrf.mxu0 }
  0xc9   : > { %v442_v36 = vpop.f32.mrf.mxu3  ;;  %v433_v37 = vadd.f32 %v3965_v28, %v432_v35  ;;  %v424_v40 = vpop.f32.mrf.mxu1  ;;  %v415_v41 = vadd.f32 %v3965_v28, %v414_v39 }
  0xca   : > { %v443_v38 = vadd.f32 %v3965_v28, %v442_v36  ;;  %v425_v42 = vadd.f32 %v3965_v28, %v424_v40 }
  0xcb   : > { %v460_v43 = vmax.f32 %v433_v37, 0.0  ;;  %v453_v45 = vmax.f32 %v415_v41, 0.0 }
  0xcc   : > { %v464_v44 = vmax.f32 %v443_v38, 0.0  ;;  %v457_v46 = vmax.f32 %v425_v42, 0.0 }
  0xcd   : > { %477 = vst [vmem:[#allocation2 + $0x79] sm:$0xff] %v460_v43 }
  0xce   : > { %481 = vst [vmem:[#allocation2 + $0xa9] sm:$0xff] %v464_v44 }
  0xcf   : > { %470 = vst [vmem:[#allocation2 + $0x21] sm:$0xff] %v453_v45 }
  0xd0   : > { %474 = vst [vmem:[#allocation2 + $0x51] sm:$0xff] %v457_v46  ;;  %v434_v47 = vpop.f32.mrf.mxu2  ;;  %v417_v51 = vpop.f32.mrf.mxu0 }
  0xd1   : > { %v444_v48 = vpop.f32.mrf.mxu3  ;;  %v435_v49 = vadd.f32 %v3965_v28, %v434_v47  ;;  %v427_v52 = vpop.f32.mrf.mxu1  ;;  %v418_v53 = vadd.f32 %v3965_v28, %v417_v51 }
  0xd2   : > { %v445_v50 = vadd.f32 %v3965_v28, %v444_v48  ;;  %v428_v54 = vadd.f32 %v3965_v28, %v427_v52 }
  0xd3   : > { %v461_v55 = vmax.f32 %v435_v49, 0.0  ;;  %v454_v57 = vmax.f32 %v418_v53, 0.0 }
  0xd4   : > { %v465_v56 = vmax.f32 %v445_v50, 0.0  ;;  %v458_v58 = vmax.f32 %v428_v54, 0.0 }
  0xd5   : > { %478 = vst [vmem:[#allocation2 + $0x81] sm:$0xff] %v461_v55 }
  0xd6   : > { %482 = vst [vmem:[#allocation2 + $0xb1] sm:$0xff] %v465_v56 }
  0xd7   : > { %471 = vst [vmem:[#allocation2 + $0x31] sm:$0xff] %v454_v57 }
  0xd8   : > { %475 = vst [vmem:[#allocation2 + $0x61] sm:$0xff] %v458_v58  ;;  %v437_v59 = vpop.f32.mrf.mxu2  ;;  %v419_v63 = vpop.f32.mrf.mxu0 }
  0xd9   : > { %v447_v60 = vpop.f32.mrf.mxu3  ;;  %v438_v61 = vadd.f32 %v3965_v28, %v437_v59  ;;  %v429_v0 = vpop.f32.mrf.mxu1  ;;  %v420_v3 = vadd.f32 %v3965_v28, %v419_v63 }
  0xda   : > { %v448_v62 = vadd.f32 %v3965_v28, %v447_v60  ;;  %v430_v4 = vadd.f32 %v3965_v28, %v429_v0 }
  0xdb   : > { %v462_v5 = vmax.f32 %v438_v61, 0.0  ;;  %v455_v7 = vmax.f32 %v420_v3, 0.0 }
  0xdc   : > { %v466_v6 = vmax.f32 %v448_v62, 0.0  ;;  %v459_v8 = vmax.f32 %v430_v4, 0.0 }
  0xdd   : > { %479 = vst [vmem:[#allocation2 + $0x91] sm:$0xff] %v462_v5 }
  0xde   : > { %483 = vst [vmem:[#allocation2 + $0xc1] sm:$0xff] %v466_v6 }
  0xdf   : > { %472 = vst [vmem:[#allocation2 + $0x39] sm:$0xff] %v455_v7 }
  0xe0   : > { %476 = vst [vmem:[#allocation2 + $0x69] sm:$0xff] %v459_v8  ;;  %v439_v9 = vpop.f32.mrf.mxu2 }
  0xe1   : > { %v449_v10 = vpop.f32.mrf.mxu3  ;;  %v440_v11 = vadd.f32 %v3965_v28, %v439_v9 }
  0xe2   : > { %v450_v12 = vadd.f32 %v3965_v28, %v449_v10  ;;  %488 = sbr.rel (%p2917_p1) target bundleno = 374 (0x176), region = 52 }
  0xe3   : > { %v463_v13 = vmax.f32 %v440_v11, 0.0 }
  0xe4   : > { %v467_v14 = vmax.f32 %v450_v12, 0.0 }
  0xe5   : > { %480 = vst [vmem:[#allocation2 + $0x99] sm:$0xff] %v463_v13 }
  0xe6   : > { %484 = vst [vmem:[#allocation2 + $0xc9] sm:$0xff] %v467_v14 }
  0xe7   : > { %v3272_v15 = vld [vmem:[%s4437_s1] sm:$0xff]  ;;  %v493_v17 = vld [vmem:[%s491_s16 + $0x8] sm:$0xff] }
  0xe8   : > { %513 = vmatpush.bf16.msra.mxu0 %v3272_v15  ;;  %v492_v16 = vld [vmem:[%s491_s16] sm:$0xff] }
  0xe9   : > { %v494_v18 = vpack.c.bf16 %v493_v17, %v492_v16 }
  0xeb   : > { %2924 = vmatmul.msk.bf16.vlgmr.msra.gmra.mxu0 %vm378_vm0, %v494_v18 }
 0x168   : > { %v515_v19 = vpop.f32.mrf.mxu0 }
 0x169   : > { %v516_v20 = vadd.f32 %v3965_v28, %v515_v19 }
 0x16b   : > { %v520_v21 = vmax.f32 %v516_v20, 0.0 }
 0x16d   : > { %522 = vst [vmem:[#allocation2 + $0x1] sm:$0xff] %v520_v21 }
 0x170   : > { %v517_v22 = vpop.f32.mrf.mxu0 }
 0x171   : > { %v518_v23 = vadd.f32 %v3965_v28, %v517_v22 }
 0x173   : > { %v521_v24 = vmax.f32 %v518_v23, 0.0 }
 0x175   : > { %523 = vst [vmem:[#allocation2 + $0x9] sm:$0xff] %v521_v24 }
 0x176 PF: > { %p2925_p4 = scmp.ne.s32.totalorder %s3708_s27, 0 }
 0x178   : > { %527 = sbr.rel (%p2925_p4) target bundleno = 385 (0x181), region = 56 }
 0x17d   : > { %v3732_v25 = vmov 0.0  }
 0x17e   : > { %528 = vst [vmem:[#allocation2] sm:$0xff] %v3732_v25 }
 0x17f   : > { %529 = vst [vmem:[#allocation2 + $0x8] sm:$0xff] %v3732_v25 }
 0x180   : > { %530 = vst [vmem:[#allocation2 + $0x10] sm:$0x3] %v3732_v25 }
 0x181 PF: > { %p2926_p11 = scmp.ge.s32.totalorder %s3708_s27, 1 }
 0x183   : > { %534 = sbr.rel (%p2926_p11) target bundleno = 535 (0x217), region = 60 }
 0x188   : > { %v3274_v26 = vld [vmem:[%s4437_s1] sm:$0xff]  ;;  %v2930_v29 = vld [vmem:[%s3923_s10 + $0x88] sm:$0xff] }
 0x189   : > { %v2929_v27 = vld [vmem:[%s3923_s10 + $0x80] sm:$0xff]  ;;  %559 = vmatpush.bf16.msra.mxu0 %v3274_v26 }
 0x18a   : > { %v540_v30 = vpack.c.bf16 %v2930_v29, %v2929_v27 }
 0x18c   : > { %2935 = vmatmul.msk.bf16.vlgmr.msra.gmra.mxu0 %vm378_vm0, %v540_v30 }
 0x209   : > { %v561_v31 = vpop.f32.mrf.mxu0 }
 0x20a   : > { %v562_v32 = vadd.f32 %v3965_v28, %v561_v31 }
 0x20c   : > { %v566_v33 = vmax.f32 %v562_v32, 0.0 }
 0x20e   : > { %569 = vst [vmem:[#allocation2 + $0xd9] sm:$0xff] %v566_v33 }
 0x211   : > { %v563_v34 = vpop.f32.mrf.mxu0 }
 0x212   : > { %v564_v35 = vadd.f32 %v3965_v28, %v563_v34 }
 0x214   : > { %v567_v36 = vmax.f32 %v564_v35, 0.0 }
 0x216   : > { %570 = vst [vmem:[#allocation2 + $0xe1] sm:$0xff] %v567_v36 }
 0x217 PF: > { %p2936_p0 = scmp.ne.s32.totalorder %s3708_s27, 1 }
 0x219   : > { %574 = sbr.rel (%p2936_p0) target bundleno = 546 (0x222), region = 64 }
 0x21e   : > { %v3733_v37 = vmov 0.0  }
 0x21f   : > { %576 = vst [vmem:[#allocation2 + $0xd8] sm:$0xff] %v3733_v37 }
 0x220   : > { %577 = vst [vmem:[#allocation2 + $0xe0] sm:$0xff] %v3733_v37 }
 0x221   : > { %578 = vst [vmem:[#allocation2 + $0xe8] sm:$0x3] %v3733_v37 }
 0x222 PF: > { %v3290_v38 = vld [vmem:[#allocation6 + $0x78] sm:$0xff]  ;;  %v3289_v40 = vld [vmem:[#allocation6 + $0x70] sm:$0xff]  ;;  %v3288_v28 = vld [vmem:[#allocation6 + $0x68] sm:$0xff]  ;;  %s4473_s11 = sld [smem:[#allocation24_spill]]  ;;  %vm2688_vm1 = vcmask 125952   ;;  %s3355_s19 = sshll.u32 %s3708_s27, 4 }
 0x223   : > { %v3282_v39 = vld [vmem:[#allocation6 + $0x38] sm:$0xff]  ;;  %3360 = vmatpush.bf16.msra.mxu2 %v3290_v38  ;;  %v3281_v41 = vld [vmem:[#allocation6 + $0x30] sm:$0xff]  ;;  %772 = vmatpush.bf16.msra.mxu0 %v3290_v38  ;;  %v3280_v42 = vld [vmem:[#allocation6 + $0x28] sm:$0xff]  ;;  %s4474_s17 = sld [smem:[#allocation16_spill]]  ;;  %s2746_s13 = sshll.u32 %s3989_s15, 4  ;;  %s2747_s13 = int_to_ptr.vmem [resolvable:$true] %s2746_s13 }
 0x224   : > { %3368 = vmatpush.bf16.msra.mxu3 %v3282_v39  ;;  %917 = vmatpush.bf16.msra.mxu1 %v3282_v39  ;;  %v3287_v43 = vld [vmem:[#allocation6 + $0x60] sm:$0xff]  ;;  %v3286_v45 = vld [vmem:[#allocation6 + $0x58] sm:$0xff]  ;;  %v3285_v47 = vld [vmem:[#allocation6 + $0x50] sm:$0xff]  ;;  %s4475_s8 = sld [smem:[#allocation26_spill]] }
 0x225   : > { %v3279_v44 = vld [vmem:[#allocation6 + $0x20] sm:$0xff]  ;;  %v3278_v46 = vld [vmem:[#allocation6 + $0x18] sm:$0xff]  ;;  %v3277_v48 = vld [vmem:[#allocation6 + $0x10] sm:$0xff]  ;;  %s4476_s5 = sld [smem:[#allocation25_spill]] }
 0x226   : > { %v635_v49 = vld [vmem:[#allocation2 + $0x61] sm:$0xff]  ;;  %v636_v50 = vld [vmem:[#allocation2 + $0x69] sm:$0xff]  ;;  %v3284_v62 = vld [vmem:[#allocation6 + $0x48] sm:$0xff] }
 0x227   : > { %3361 = vmatpush.bf16.msra.mxu2 %v3289_v40  ;;  %773 = vmatpush.bf16.msra.mxu0 %v3289_v40  ;;  %v587_v51 = vld [vmem:[#allocation2 + $0x60] sm:$0xff]  ;;  %v588_v52 = vld [vmem:[#allocation2 + $0x68] sm:$0xff]  ;;  %v651_v57 = vpack.c.bf16 %v635_v49, %v635_v49  ;;  %v652_v58 = vpack.c.bf16 %v636_v50, %v636_v50  ;;  %v3276_v63 = vld [vmem:[#allocation6 + $0x8] sm:$0xff] }
 0x228   : > { %3369 = vmatpush.bf16.msra.mxu3 %v3281_v41  ;;  %918 = vmatpush.bf16.msra.mxu1 %v3281_v41  ;;  %v627_v53 = vld [vmem:[#allocation2 + $0x1] sm:$0xff]  ;;  %v628_v54 = vld [vmem:[#allocation2 + $0x9] sm:$0xff]  ;;  %v603_v59 = vpack.c.bf16 %v587_v51, %v587_v51  ;;  %v604_v60 = vpack.c.bf16 %v588_v52, %v588_v52  ;;  %v637_v24 = vld [vmem:[#allocation2 + $0x79] sm:$0xff] }
 0x229   : > { %v579_v55 = vld [vmem:[#allocation2] sm:$0xff]  ;;  %v580_v56 = vld [vmem:[#allocation2 + $0x8] sm:$0xff]  ;;  %v643_v61 = vpack.c.bf16 %v627_v53, %v627_v53  ;;  %v644_v0 = vpack.c.bf16 %v628_v54, %v628_v54  ;;  %v700_v5 = vunpack.c.l.b16 %v651_v57  ;;  %v701_v6 = vunpack.c.l.b16 %v652_v58  ;;  %v3283_v9 = vld [vmem:[#allocation6 + $0x40] sm:$0xff]  ;;  %s3261_s20 = sshll.u32 %s4474_s17, 5 }
 0x22a   : > { %v595_v3 = vpack.c.bf16 %v579_v55, %v579_v55  ;;  %v596_v4 = vpack.c.bf16 %v580_v56, %v580_v56  ;;  %v845_v7 = vunpack.c.l.b16 %v603_v59  ;;  %v846_v8 = vunpack.c.l.b16 %v604_v60  ;;  %v3275_v10 = vld [vmem:[#allocation6] sm:$0xff]  ;;  %v3298_v15 = vld [vmem:[#allocation6 + $0xb8] sm:$0xff]  ;;  %v3297_v22 = vld [vmem:[#allocation6 + $0xb0] sm:$0xff]  ;;  %s2723_s24 = sadd.s32 %s3355_s19, %s3261_s20  ;;  %s2726_s19 = sshll.u32 %s3985_s2, 4  ;;  %s4368_s19 = int_to_ptr.vmem [resolvable:$true] %s2726_s19 }
 0x22b   : > { %3362 = vmatpush.bf16.msra.mxu2 %v3288_v28  ;;  %774 = vmatpush.bf16.msra.mxu0 %v3288_v28  ;;  %v692_v11 = vunpack.c.l.b16 %v643_v61  ;;  %v693_v12 = vunpack.c.l.b16 %v644_v0  ;;  %v3306_v16 = vld [vmem:[#allocation6 + $0xf8] sm:$0xff]  ;;  %v4013_v17 = vpack.c.b16 %v701_v6, %v700_v5  ;;  %v3305_v23 = vld [vmem:[#allocation6 + $0xf0] sm:$0xff]  ;;  %v589_v26 = vld [vmem:[#allocation2 + $0x78] sm:$0xff]  ;;  %v653_v37 = vpack.c.bf16 %v637_v24, %v637_v24  ;;  %s3266_s18 = sshll.u32 %s2723_s24, 3  ;;  %s3262_s27 = sshll.u32 %s2723_s24, 2 }
 0x22c   : > { %3370 = vmatpush.bf16.msra.mxu3 %v3280_v42  ;;  %919 = vmatpush.bf16.msra.mxu1 %v3280_v42  ;;  %v837_v13 = vunpack.c.l.b16 %v595_v3  ;;  %v838_v14 = vunpack.c.l.b16 %v596_v4  ;;  %v4015_v18 = vpack.c.b16 %v846_v8, %v845_v7  ;;  %v3314_v21 = vld [vmem:[#allocation6 + $0x138] sm:$0xff]  ;;  %v590_v27 = vld [vmem:[#allocation2 + $0x80] sm:$0xff]  ;;  %v581_v31 = vld [vmem:[#allocation2 + $0x18] sm:$0xff]  ;;  %v605_v39 = vpack.c.bf16 %v589_v26, %v589_v26  ;;  %s2745_s9 = scalar_lea.hbm %s4475_s8, %s3266_s18  ;;  %s2725_s28 = scalar_lea.hbm %s4476_s5, %s3262_s27 }
 0x22d   : > { %v708_v19 = vpack.c.b16 %v693_v12, %v692_v11  ;;  %v638_v25 = vld [vmem:[#allocation2 + $0x81] sm:$0xff]  ;;  %v629_v29 = vld [vmem:[#allocation2 + $0x19] sm:$0xff]  ;;  %v606_v40 = vpack.c.bf16 %v590_v27, %v590_v27  ;;  %v597_v42 = vpack.c.bf16 %v581_v31, %v581_v31  ;;  %v3311_v55 = vld [vmem:[#allocation6 + $0x120] sm:$0xff]  ;;  %s2748_s17 = sshll.u32 %s2745_s9, 4  ;;  %s2728_s24 = sshll.u32 %s2725_s28, 4  ;;  %s2749_s17 = int_to_ptr.hbm [resolvable:$true] %s2748_s17  ;;  %s4370_s24 = int_to_ptr.hbm [resolvable:$true] %s2728_s24 }
 0x22e   : > { %v853_v20 = vpack.c.b16 %v838_v14, %v837_v13  ;;  %v630_v30 = vld [vmem:[#allocation2 + $0x21] sm:$0xff]  ;;  %v3296_v35 = vld [vmem:[#allocation6 + $0xa8] sm:$0xff]  ;;  %v654_v38 = vpack.c.bf16 %v638_v25, %v638_v25  ;;  %v645_v41 = vpack.c.bf16 %v629_v29, %v629_v29  ;;  %v847_v49 = vunpack.c.l.b16 %v605_v39  ;;  %v591_v6 = vld [vmem:[#allocation2 + $0x90] sm:$0xff]  ;;  %s2711_s18 = scalar_lea.sflag [#allocation10], %s3915_s3  ;;  %s3580_s27 = sshra.s32 %s2749_s17, 4  ;;  %s3581_s27 = int_to_ptr.hbm [resolvable:$true] %s3580_s27 }
 0x22f   : > { %3363 = vmatpush.bf16.msra.mxu2 %v3287_v43  ;;  %775 = vmatpush.bf16.msra.mxu0 %v3287_v43  ;;  %v582_v32 = vld [vmem:[#allocation2 + $0x20] sm:$0xff]  ;;  %v3322_v34 = vld [vmem:[#allocation6 + $0x178] sm:$0xff]  ;;  %v3304_v36 = vld [vmem:[#allocation6 + $0xe8] sm:$0xff]  ;;  %v646_v28 = vpack.c.bf16 %v630_v30, %v630_v30  ;;  %v848_v50 = vunpack.c.l.b16 %v606_v40  ;;  %v839_v53 = vunpack.c.l.b16 %v597_v42  ;;  %s3586_s9 = scalar_lea.hbm %s4475_s8, 512  ;;  %p3587_p7 = scmp.lt.s32.totalorder %s3581_s27, %s4475_s8 }
 0x230   : > { %3371 = vmatpush.bf16.msra.mxu3 %v3279_v44  ;;  %920 = vmatpush.bf16.msra.mxu1 %v3279_v44  ;;  %v3313_v33 = vld [vmem:[#allocation6 + $0x130] sm:$0xff]  ;;  %v598_v43 = vpack.c.bf16 %v582_v32, %v582_v32  ;;  %v3312_v44 = vld [vmem:[#allocation6 + $0x128] sm:$0xff]  ;;  %v694_v51 = vunpack.c.l.b16 %v645_v41  ;;  %v3294_v56 = vld [vmem:[#allocation6 + $0x98] sm:$0xff] }
 0x231   : > { %v695_v52 = vunpack.c.l.b16 %v646_v28  ;;  %v3302_v57 = vld [vmem:[#allocation6 + $0xd8] sm:$0xff]  ;;  %v4021_v59 = vpack.c.b16 %v848_v50, %v847_v49  ;;  %v3293_v0 = vld [vmem:[#allocation6 + $0x90] sm:$0xff]  ;;  %v592_v7 = vld [vmem:[#allocation2 + $0x98] sm:$0xff] }
 0x232   : > { %v840_v54 = vunpack.c.l.b16 %v598_v43  ;;  %v3301_v3 = vld [vmem:[#allocation6 + $0xd0] sm:$0xff]  ;;  %v631_v8 = vld [vmem:[#allocation2 + $0x31] sm:$0xff]  ;;  %v3318_v39 = vld [vmem:[#allocation6 + $0x158] sm:$0xff] }
 0x233   : > { %3364 = vmatpush.bf16.msra.mxu2 %v3286_v45  ;;  %776 = vmatpush.bf16.msra.mxu0 %v3286_v45  ;;  %v3295_v45 = vld [vmem:[#allocation6 + $0xa0] sm:$0xff]  ;;  %v4023_v60 = vpack.c.b16 %v695_v52, %v694_v51  ;;  %v3321_v4 = vld [vmem:[#allocation6 + $0x170] sm:$0xff]  ;;  %v584_v11 = vld [vmem:[#allocation2 + $0x38] sm:$0xff] }
 0x234   : > { %3372 = vmatpush.bf16.msra.mxu3 %v3278_v46  ;;  %921 = vmatpush.bf16.msra.mxu1 %v3278_v46  ;;  %v3303_v46 = vld [vmem:[#allocation6 + $0xe0] sm:$0xff]  ;;  %v4025_v61 = vpack.c.b16 %v840_v54, %v839_v53  ;;  %v640_v5 = vld [vmem:[#allocation2 + $0x99] sm:$0xff]  ;;  %v600_v25 = vpack.c.bf16 %v584_v11, %v584_v11  ;;  %v3330_v50 = vld [vmem:[#allocation6 + $0x1b8] sm:$0xff] }
 0x235   : > { %v3309_v12 = vld [vmem:[#allocation6 + $0x110] sm:$0xff]  ;;  %v3320_v13 = vld [vmem:[#allocation6 + $0x168] sm:$0xff]  ;;  %v3319_v26 = vld [vmem:[#allocation6 + $0x160] sm:$0xff] }
 0x236   : > { %v3292_v14 = vld [vmem:[#allocation6 + $0x88] sm:$0xff]  ;;  %v3291_v29 = vld [vmem:[#allocation6 + $0x80] sm:$0xff]  ;;  %v585_v52 = vld [vmem:[#allocation2 + $0x48] sm:$0xff] }
 0x237   : > { %3365 = vmatpush.bf16.msra.mxu2 %v3285_v47  ;;  %777 = vmatpush.bf16.msra.mxu0 %v3285_v47  ;;  %v702_v47 = vunpack.c.l.b16 %v653_v37  ;;  %v3308_v27 = vld [vmem:[#allocation6 + $0x108] sm:$0xff]  ;;  %v3299_v30 = vld [vmem:[#allocation6 + $0xc0] sm:$0xff]  ;;  %v3338_v53 = vld [vmem:[#allocation6 + $0x1f8] sm:$0xff] }
 0x238   : > { %3373 = vmatpush.bf16.msra.mxu3 %v3277_v48  ;;  %922 = vmatpush.bf16.msra.mxu1 %v3277_v48  ;;  %v703_v48 = vunpack.c.l.b16 %v654_v38  ;;  %v842_v38 = vunpack.c.l.b16 %v600_v25  ;;  %v3307_v40 = vld [vmem:[#allocation6 + $0x100] sm:$0xff]  ;;  %v3337_v25 = vld [vmem:[#allocation6 + $0x1f0] sm:$0xff] }
 0x239   : > { %v633_v49 = vld [vmem:[#allocation2 + $0x49] sm:$0xff]  ;;  %v634_v51 = vld [vmem:[#allocation2 + $0x51] sm:$0xff] }
 0x23a   : > { %v4019_v58 = vpack.c.b16 %v703_v48, %v702_v47  ;;  %v3317_v47 = vld [vmem:[#allocation6 + $0x150] sm:$0xff]  ;;  %v594_v48 = vld [vmem:[#allocation2 + $0xb0] sm:$0xff] }
 0x23b   : > { %3366 = vmatpush.bf16.msra.mxu2 %v3284_v62  ;;  %778 = vmatpush.bf16.msra.mxu0 %v3284_v62  ;;  %v3310_v62 = vld [vmem:[#allocation6 + $0x118] sm:$0xff]  ;;  %v586_v54 = vld [vmem:[#allocation2 + $0x50] sm:$0xff] }
 0x23c   : > { %3374 = vmatpush.bf16.msra.mxu3 %v3276_v63  ;;  %923 = vmatpush.bf16.msra.mxu1 %v3276_v63  ;;  %v639_v63 = vld [vmem:[#allocation2 + $0x91] sm:$0xff] }
 0x23f   : > { %3367 = vmatpush.bf16.msra.mxu2 %v3283_v9  ;;  %779 = vmatpush.bf16.msra.mxu0 %v3283_v9  ;;  %v632_v9 = vld [vmem:[#allocation2 + $0x39] sm:$0xff] }
 0x240   : > { %3375 = vmatpush.bf16.msra.mxu3 %v3275_v10  ;;  %924 = vmatpush.bf16.msra.mxu1 %v3275_v10  ;;  %v583_v10 = vld [vmem:[#allocation2 + $0x30] sm:$0xff] }
 0x241   : > { %v599_v24 = vpack.c.bf16 %v583_v10, %v583_v10 }
 0x242   : > { %800 = vmatmul.bf16.vlgmr.msra.gmra.mxu2 %v4013_v17  ;;  %780 = vmatmul.bf16.vlgmr.msra.gmra.mxu0 %v708_v19  ;;  %v656_v19 = vpack.c.bf16 %v640_v5, %v640_v5  ;;  %v601_v5 = vpack.c.bf16 %v585_v52, %v585_v52 }
 0x243   : > { %1111 = vmatpush.bf16.msrb.mxu2 %v3298_v15  ;;  %945 = vmatmul.bf16.vlgmr.msra.gmra.mxu3 %v4015_v18  ;;  %v3300_v15 = vld [vmem:[#allocation6 + $0xc8] sm:$0xff]  ;;  %v841_v37 = vunpack.c.l.b16 %v599_v24  ;;  %v967_v24 = vld [vmem:[#allocation2 + $0xa] sm:$0xff] }
 0x244   : > { %1321 = vmatpush.bf16.msrb.mxu3 %v3306_v16  ;;  %925 = vmatmul.bf16.vlgmr.msra.gmra.mxu1 %v853_v20  ;;  %v655_v16 = vpack.c.bf16 %v639_v63, %v639_v63  ;;  %v607_v20 = vpack.c.bf16 %v591_v6, %v591_v6  ;;  %v705_v32 = vunpack.c.l.b16 %v656_v19  ;;  %v602_v6 = vpack.c.bf16 %v586_v54, %v586_v54  ;;  %v1600_v54 = vld [vmem:[#allocation2 + $0x4a] sm:$0xff] }
 0x245   : > { %1531 = vmatpush.bf16.msrb.mxu0 %v3314_v21  ;;  %1741 = vmatpush.bf16.msrb.mxu1 %v3322_v34  ;;  %v608_v21 = vpack.c.bf16 %v592_v7, %v592_v7  ;;  %v4037_v43 = vpack.c.b16 %v842_v38, %v841_v37  ;;  %v3315_v7 = vld [vmem:[#allocation6 + $0x140] sm:$0xff] }
 0x246   : > { %v704_v31 = vunpack.c.l.b16 %v655_v16 }
 0x247   : > { %1112 = vmatpush.bf16.msrb.mxu2 %v3297_v22  ;;  %v647_v22 = vpack.c.bf16 %v631_v8, %v631_v8  ;;  %v850_v34 = vunpack.c.l.b16 %v608_v21 }
 0x248   : > { %1322 = vmatpush.bf16.msrb.mxu3 %v3305_v23  ;;  %v648_v23 = vpack.c.bf16 %v632_v9, %v632_v9  ;;  %v4031_v41 = vpack.c.b16 %v705_v32, %v704_v31  ;;  %v983_v31 = vpack.c.bf16 %v967_v24, %v967_v24 }
 0x249   : > { %1532 = vmatpush.bf16.msrb.mxu0 %v3313_v33  ;;  %1742 = vmatpush.bf16.msrb.mxu1 %v3321_v4  ;;  %v849_v33 = vunpack.c.l.b16 %v607_v20  ;;  %v650_v4 = vpack.c.bf16 %v634_v51, %v634_v51 }
 0x24b   : > { %1113 = vmatpush.bf16.msrb.mxu2 %v3296_v35  ;;  %v696_v35 = vunpack.c.l.b16 %v647_v22  ;;  %v4033_v28 = vpack.c.b16 %v850_v34, %v849_v33  ;;  %v966_v22 = vld [vmem:[#allocation2 + $0x2] sm:$0xff] }
 0x24c   : > { %1323 = vmatpush.bf16.msrb.mxu3 %v3304_v36  ;;  %v697_v36 = vunpack.c.l.b16 %v648_v23  ;;  %v3329_v23 = vld [vmem:[#allocation6 + $0x1b0] sm:$0xff] }
 0x24d   : > { %1533 = vmatpush.bf16.msrb.mxu0 %v3312_v44  ;;  %1743 = vmatpush.bf16.msrb.mxu1 %v3320_v13  ;;  %v641_v44 = vld [vmem:[#allocation2 + $0xa9] sm:$0xff]  ;;  %v699_v13 = vunpack.c.l.b16 %v650_v4 }
 0x24e   : > { %v4035_v42 = vpack.c.b16 %v697_v36, %v696_v35  ;;  %v1032_v35 = vunpack.c.l.b16 %v983_v31  ;;  %v1603_v4 = vld [vmem:[#allocation2 + $0x6a] sm:$0xff]  ;;  %v1606_v31 = vld [vmem:[#allocation2 + $0x92] sm:$0xff] }
 0x24f   : > { %1114 = vmatpush.bf16.msrb.mxu2 %v3295_v45  ;;  %v642_v45 = vld [vmem:[#allocation2 + $0xb1] sm:$0xff] }
 0x250   : > { %1324 = vmatpush.bf16.msrb.mxu3 %v3303_v46  ;;  %v593_v46 = vld [vmem:[#allocation2 + $0xa8] sm:$0xff] }
 0x251   : > { %1534 = vmatpush.bf16.msrb.mxu0 %v3311_v55  ;;  %1744 = vmatpush.bf16.msrb.mxu1 %v3319_v26  ;;  %v3316_v55 = vld [vmem:[#allocation6 + $0x148] sm:$0xff]  ;;  %v609_v63 = vpack.c.bf16 %v593_v46, %v593_v46  ;;  %v3345_v26 = vld [vmem:[#allocation6 + $0x230] sm:$0xff] }
 0x252   : > { %805 = vmatmul.bf16.gmra.mxu2 %v4019_v58  ;;  %785 = vmatmul.bf16.gmra.mxu0 %v4023_v60  ;;  %v1598_v46 = vld [vmem:[#allocation2 + $0x32] sm:$0xff] }
 0x253   : > { %1115 = vmatpush.bf16.msrb.mxu2 %v3294_v56  ;;  %950 = vmatmul.bf16.gmra.mxu3 %v4021_v59  ;;  %v3346_v56 = vld [vmem:[#allocation6 + $0x238] sm:$0xff]  ;;  %v851_v10 = vunpack.c.l.b16 %v609_v63 }
 0x254   : > { %1325 = vmatpush.bf16.msrb.mxu3 %v3302_v57  ;;  %930 = vmatmul.bf16.gmra.mxu1 %v4025_v61  ;;  %v657_v57 = vpack.c.bf16 %v641_v44, %v641_v44  ;;  %v3336_v44 = vld [vmem:[#allocation6 + $0x1e8] sm:$0xff] }
 0x255   : > { %1535 = vmatpush.bf16.msrb.mxu0 %v3310_v62  ;;  %1745 = vmatpush.bf16.msrb.mxu1 %v3318_v39  ;;  %v658_v62 = vpack.c.bf16 %v642_v45, %v642_v45  ;;  %v3344_v45 = vld [vmem:[#allocation6 + $0x228] sm:$0xff] }
 0x256   : > { %v706_v8 = vunpack.c.l.b16 %v657_v57 }
 0x257   : > { %1116 = vmatpush.bf16.msrb.mxu2 %v3293_v0  ;;  %v610_v0 = vpack.c.bf16 %v594_v48, %v594_v48  ;;  %v707_v9 = vunpack.c.l.b16 %v658_v62  ;;  %v1614_v48 = vpack.c.bf16 %v1598_v46, %v1598_v46 }
 0x258   : > { %1326 = vmatpush.bf16.msrb.mxu3 %v3301_v3  ;;  %v649_v3 = vpack.c.bf16 %v633_v49, %v633_v49 }
 0x259   : > { %1536 = vmatpush.bf16.msrb.mxu0 %v3309_v12  ;;  %1746 = vmatpush.bf16.msrb.mxu1 %v3317_v47  ;;  %v852_v11 = vunpack.c.l.b16 %v610_v0  ;;  %v4043_v16 = vpack.c.b16 %v707_v9, %v706_v8  ;;  %v1599_v47 = vld [vmem:[#allocation2 + $0x3a] sm:$0xff] }
 0x25a   : > { %v698_v12 = vunpack.c.l.b16 %v649_v3  ;;  %v1615_v49 = vpack.c.bf16 %v1599_v47, %v1599_v47  ;;  %v1602_v3 = vld [vmem:[#allocation2 + $0x62] sm:$0xff] }
 0x25b   : > { %1117 = vmatpush.bf16.msrb.mxu2 %v3292_v14  ;;  %v843_v14 = vunpack.c.l.b16 %v601_v5  ;;  %v4045_v19 = vpack.c.b16 %v852_v11, %v851_v10  ;;  %v1618_v5 = vpack.c.bf16 %v1602_v3, %v1602_v3  ;;  %v3325_v11 = vld [vmem:[#allocation6 + $0x190] sm:$0xff] }
 0x25c   : > { %1327 = vmatpush.bf16.msrb.mxu3 %v3300_v15  ;;  %v844_v15 = vunpack.c.l.b16 %v602_v6  ;;  %v4047_v20 = vpack.c.b16 %v699_v13, %v698_v12  ;;  %v1664_v51 = vunpack.c.l.b16 %v1615_v49  ;;  %v1619_v6 = vpack.c.bf16 %v1603_v4, %v1603_v4  ;;  %v3333_v12 = vld [vmem:[#allocation6 + $0x1d0] sm:$0xff] }
 0x25d   : > { %1537 = vmatpush.bf16.msrb.mxu0 %v3308_v27  ;;  %1747 = vmatpush.bf16.msrb.mxu1 %v3316_v55  ;;  %v1596_v27 = vld [vmem:[#allocation2 + $0x1a] sm:$0xff]  ;;  %v1601_v55 = vld [vmem:[#allocation2 + $0x52] sm:$0xff]  ;;  %v1667_v8 = vunpack.c.l.b16 %v1618_v5 }
 0x25e   : > { %v4049_v21 = vpack.c.b16 %v844_v15, %v843_v14  ;;  %v1612_v32 = vpack.c.bf16 %v1596_v27, %v1596_v27  ;;  %v1617_v57 = vpack.c.bf16 %v1601_v55, %v1601_v55  ;;  %v1668_v9 = vunpack.c.l.b16 %v1619_v6  ;;  %v1604_v13 = vld [vmem:[#allocation2 + $0x7a] sm:$0xff]  ;;  %v1605_v14 = vld [vmem:[#allocation2 + $0x82] sm:$0xff] }
 0x25f   : > { %1118 = vmatpush.bf16.msrb.mxu2 %v3291_v29  ;;  %v1597_v29 = vld [vmem:[#allocation2 + $0x22] sm:$0xff]  ;;  %v1620_v15 = vpack.c.bf16 %v1604_v13, %v1604_v13 }
 0x260   : > { %1328 = vmatpush.bf16.msrb.mxu3 %v3299_v30  ;;  %v982_v30 = vpack.c.bf16 %v966_v22, %v966_v22  ;;  %v1613_v33 = vpack.c.bf16 %v1597_v29, %v1597_v29  ;;  %v1661_v36 = vunpack.c.l.b16 %v1612_v32  ;;  %v1666_v63 = vunpack.c.l.b16 %v1617_v57  ;;  %v1607_v32 = vld [vmem:[#allocation2 + $0x9a] sm:$0xff] }
 0x261   : > { %1538 = vmatpush.bf16.msrb.mxu0 %v3307_v40  ;;  %1748 = vmatpush.bf16.msrb.mxu1 %v3315_v7  ;;  %v3328_v40 = vld [vmem:[#allocation6 + $0x1a8] sm:$0xff]  ;;  %v3342_v7 = vld [vmem:[#allocation6 + $0x218] sm:$0xff]  ;;  %v4068_v10 = vpack.c.b16 %v1668_v9, %v1667_v8  ;;  %v1621_v22 = vpack.c.bf16 %v1605_v14, %v1605_v14  ;;  %v1669_v24 = vunpack.c.l.b16 %v1620_v15 }
 0x262   : > { %810 = vmatmul.bf16.gmra.mxu2 %v4031_v41  ;;  %790 = vmatmul.bf16.gmra.mxu0 %v4035_v42  ;;  %v1031_v34 = vunpack.c.l.b16 %v982_v30  ;;  %v1662_v37 = vunpack.c.l.b16 %v1613_v33  ;;  %v3332_v30 = vld [vmem:[#allocation6 + $0x1c8] sm:$0xff]  ;;  %v1400_v13 = vld [vmem:[#allocation2 + $0xc1] sm:$0xff]  ;;  %v1401_v14 = vld [vmem:[#allocation2 + $0xc9] sm:$0xff] }
 0x263   : > { %955 = vmatmul.bf16.gmra.mxu3 %v4033_v28  ;;  %1952 = vmatpush.bf16.msra.mxu2 %v3330_v50  ;;  %v1663_v50 = vunpack.c.l.b16 %v1614_v48  ;;  %v1610_v15 = vld [vmem:[#allocation2 + $0xc2] sm:$0xff] }
 0x264   : > { %935 = vmatmul.bf16.gmra.mxu1 %v4037_v43  ;;  %2162 = vmatpush.bf16.msra.mxu3 %v3338_v53  ;;  %v1047_v38 = vpack.c.b16 %v1032_v35, %v1031_v34  ;;  %v1677_v39 = vpack.c.b16 %v1662_v37, %v1661_v36  ;;  %v3343_v53 = vld [vmem:[#allocation6 + $0x220] sm:$0xff]  ;;  %v1622_v36 = vpack.c.bf16 %v1606_v31, %v1606_v31 }
 0x265   : > { %2372 = vmatpush.bf16.msra.mxu0 %v3346_v56  ;;  %v4057_v52 = vpack.c.b16 %v1664_v51, %v1663_v50  ;;  %v1616_v56 = vpack.c.bf16 %v1600_v54, %v1600_v54  ;;  %v1623_v37 = vpack.c.bf16 %v1607_v32, %v1607_v32  ;;  %v3323_v51 = vld [vmem:[#allocation6 + $0x180] sm:$0xff]  ;;  %v1626_v31 = vpack.c.bf16 %v1610_v15, %v1610_v15 }
 0x267   : > { %1953 = vmatpush.bf16.msra.mxu2 %v3329_v23  ;;  %v1665_v62 = vunpack.c.l.b16 %v1616_v56  ;;  %v3341_v23 = vld [vmem:[#allocation6 + $0x210] sm:$0xff] }
 0x268   : > { %2163 = vmatpush.bf16.msra.mxu3 %v3337_v25  ;;  %v1670_v25 = vunpack.c.l.b16 %v1621_v22  ;;  %v1611_v22 = vld [vmem:[#allocation2 + $0xca] sm:$0xff] }
 0x269   : > { %2373 = vmatpush.bf16.msra.mxu0 %v3345_v26  ;;  %v4062_v0 = vpack.c.b16 %v1666_v63, %v1665_v62 }
 0x26a   : > { %v4074_v26 = vpack.c.b16 %v1670_v25, %v1669_v24 }
 0x26b   : > { %1954 = vmatpush.bf16.msra.mxu2 %v3328_v40  ;;  %v1671_v40 = vunpack.c.l.b16 %v1622_v36 }
 0x26c   : > { %2164 = vmatpush.bf16.msra.mxu3 %v3336_v44 }
 0x26d   : > { %2374 = vmatpush.bf16.msra.mxu0 %v3344_v45 }
 0x271   : > { %2375 = vmatpush.bf16.msra.mxu0 %v3343_v53  ;;  %v1609_v53 = vld [vmem:[#allocation2 + $0xb2] sm:$0xff] }
 0x272   : > { %815 = vmatmul.bf16.gmra.mxu2 %v4043_v16  ;;  %795 = vmatmul.bf16.gmra.mxu0 %v4047_v20  ;;  %v1625_v62 = vpack.c.bf16 %v1609_v53, %v1609_v53 }
 0x273   : > { %960 = vmatmul.bf16.gmra.mxu3 %v4045_v19 }
 0x274   : > { %940 = vmatmul.bf16.gmra.mxu1 %v4049_v21 }
 0x275   : > { %2376 = vmatpush.bf16.msra.mxu0 %v3342_v7 }
 0x279   : > { %2377 = vmatpush.bf16.msra.mxu0 %v3341_v23 }
 0x282   : > { %1119 = vmatmul.bf16.vlgmr.msrb.gmra.mxu2 %v1047_v38  ;;  %1539 = vmatmul.bf16.vlgmr.msrb.gmra.mxu0 %v4023_v60  ;;  %v3335_v60 = vld [vmem:[#allocation6 + $0x1e0] sm:$0xff] }
 0x283   : > { %1329 = vmatmul.bf16.vlgmr.msrb.gmra.mxu3 %v4025_v61  ;;  %v3327_v61 = vld [vmem:[#allocation6 + $0x1a0] sm:$0xff] }
 0x284   : > { %1749 = vmatmul.bf16.vlgmr.msrb.gmra.mxu1 %v1677_v39  ;;  %1955 = vmatpush.bf16.msra.mxu2 %v3327_v61  ;;  %v3331_v61 = vld [vmem:[#allocation6 + $0x1c0] sm:$0xff] }
 0x285   : > { %2165 = vmatpush.bf16.msra.mxu3 %v3335_v60  ;;  %v1608_v60 = vld [vmem:[#allocation2 + $0xaa] sm:$0xff] }
 0x286   : > { %v1624_v57 = vpack.c.bf16 %v1608_v60, %v1608_v60 }
 0x292   : > { %1124 = vmatmul.bf16.gmra.mxu2 %v1677_v39  ;;  %1544 = vmatmul.bf16.gmra.mxu0 %v4035_v42  ;;  %v3326_v42 = vld [vmem:[#allocation6 + $0x198] sm:$0xff] }
 0x293   : > { %1334 = vmatmul.bf16.gmra.mxu3 %v4037_v43  ;;  %v3334_v43 = vld [vmem:[#allocation6 + $0x1d8] sm:$0xff]  ;;  %1956 = vmatpush.bf16.msra.mxu2 %v3326_v42 }
 0x294   : > { %1754 = vmatmul.bf16.gmra.mxu1 %v4057_v52  ;;  %2166 = vmatpush.bf16.msra.mxu3 %v3334_v43  ;;  %v1673_v43 = vunpack.c.l.b16 %v1624_v57  ;;  %v2017_v57 = vld [vmem:[#allocation2 + $0x31] sm:$0xff] }
 0x297   : > { %1957 = vmatpush.bf16.msra.mxu2 %v3325_v11  ;;  %v1190_v11 = vld [vmem:[#allocation2 + $0xc0] sm:$0xff] }
 0x298   : > { %2167 = vmatpush.bf16.msra.mxu3 %v3333_v12  ;;  %v1191_v12 = vld [vmem:[#allocation2 + $0xc8] sm:$0xff] }
 0x29c   : > { %2168 = vmatpush.bf16.msra.mxu3 %v3332_v30  ;;  %v1417_v30 = vpack.c.bf16 %v1401_v14, %v1401_v14 }
 0x2a0   : > { %2169 = vmatpush.bf16.msra.mxu3 %v3331_v61 }
 0x2a2   : > { %1129 = vmatmul.bf16.gmra.mxu2 %v4057_v52  ;;  %1549 = vmatmul.bf16.gmra.mxu0 %v4047_v20 }
 0x2a3   : > { %1339 = vmatmul.bf16.gmra.mxu3 %v4049_v21 }
 0x2a4   : > { %1759 = vmatmul.bf16.gmra.mxu1 %v4062_v0 }
 0x2b2   : > { %1134 = vmatmul.bf16.gmra.mxu2 %v4062_v0  ;;  %1554 = vmatmul.bf16.gmra.mxu0 %v4013_v17  ;;  %v3324_v17 = vld [vmem:[#allocation6 + $0x188] sm:$0xff] }
 0x2b3   : > { %1344 = vmatmul.bf16.gmra.mxu3 %v4015_v18  ;;  %1958 = vmatpush.bf16.msra.mxu2 %v3324_v17  ;;  %v1416_v17 = vpack.c.bf16 %v1400_v13, %v1400_v13 }
 0x2b4   : > { %1764 = vmatmul.bf16.gmra.mxu1 %v4068_v10 }
 0x2b5   : > { %v1465_v36 = vunpack.c.l.b16 %v1416_v17 }
 0x2b7   : > { %1959 = vmatpush.bf16.msra.mxu2 %v3323_v51 }
 0x2bf   : > { %v781_v27 = vpop.f32.mrf.mxu0 }
 0x2c1   : > { %v926_v18 = vpop.f32.mrf.mxu1 }
 0x2c2   : > { %v4076_v29 = vadd.f32 %v926_v18, %v781_v27  ;;  %1139 = vmatmul.bf16.gmra.mxu2 %v4068_v10  ;;  %1559 = vmatmul.bf16.gmra.mxu0 %v4019_v58  ;;  %v1672_v58 = vunpack.c.l.b16 %v1623_v37  ;;  %v1206_v27 = vpack.c.bf16 %v1190_v11, %v1190_v11  ;;  %v1207_v18 = vpack.c.bf16 %v1191_v12, %v1191_v12  ;;  %v3354_v12 = vld [vmem:[%s4473_s11 + $0x38] sm:$0xff] }
 0x2c3   : > { %1349 = vmatmul.bf16.gmra.mxu3 %v4021_v59  ;;  %v3340_v59 = vld [vmem:[#allocation6 + $0x208] sm:$0xff]  ;;  %v1466_v37 = vunpack.c.l.b16 %v1417_v30  ;;  %2543 = vmatpush.bf16.msra.mxu1 %v3354_v12 }
 0x2c4   : > { %1769 = vmatmul.bf16.gmra.mxu1 %v4074_v26  ;;  %2378 = vmatpush.bf16.msra.mxu0 %v3340_v59  ;;  %v4090_v47 = vpack.c.b16 %v1672_v58, %v1671_v40  ;;  %v1675_v59 = vunpack.c.l.b16 %v1626_v31 }
 0x2c5   : > { %v801_v33 = vpop.f32.mrf.mxu2 }
 0x2c6   : > { %v946_v34 = vpop.f32.mrf.mxu3 }
 0x2c7   : > { %v4082_v35 = vadd.f32 %v946_v34, %v801_v33  ;;  %v4084_v38 = vpop.f32.mrf.mxu0  ;;  %v1255_v33 = vunpack.c.l.b16 %v1206_v27  ;;  %v1256_v34 = vunpack.c.l.b16 %v1207_v18 }
 0x2c9   : > { %v4086_v39 = vpop.f32.mrf.mxu1 }
 0x2cd   : > { %v803_v44 = vpop.f32.mrf.mxu2 }
 0x2ce   : > { %v948_v45 = vpop.f32.mrf.mxu3 }
 0x2cf   : > { %v4088_v46 = vadd.f32 %v948_v45, %v803_v44  ;;  %v786_v48 = vpop.f32.mrf.mxu0 }
 0x2d1   : > { %v931_v49 = vpop.f32.mrf.mxu1 }
 0x2d2   : > { %v4092_v50 = vadd.f32 %v931_v49, %v786_v48  ;;  %1144 = vmatmul.bf16.gmra.mxu2 %v4074_v26  ;;  %1564 = vmatmul.bf16.gmra.mxu0 %v4031_v41  ;;  %v1674_v41 = vunpack.c.l.b16 %v1625_v62  ;;  %v4122_v48 = vpack.c.b16 %v1256_v34, %v1255_v33  ;;  %v4124_v49 = vpack.c.b16 %v1466_v37, %v1465_v36  ;;  %v2018_v62 = vld [vmem:[#allocation2 + $0x39] sm:$0xff]  ;;  %v3353_v37 = vld [vmem:[%s4473_s11 + $0x30] sm:$0xff] }
 0x2d3   : > { %1354 = vmatmul.bf16.gmra.mxu3 %v4033_v28  ;;  %v3339_v28 = vld [vmem:[#allocation6 + $0x200] sm:$0xff]  ;;  %2544 = vmatpush.bf16.msra.mxu1 %v3353_v37  ;;  %v2024_v37 = vld [vmem:[#allocation2 + $0x81] sm:$0xff] }
 0x2d4   : > { %1774 = vmatmul.bf16.gmra.mxu1 %v4090_v47  ;;  %2379 = vmatpush.bf16.msra.mxu0 %v3339_v28  ;;  %v4106_v6 = vpack.c.b16 %v1674_v41, %v1673_v43 }
 0x2d5   : > { %v806_v54 = vpop.f32.mrf.mxu2 }
 0x2d6   : > { %v951_v55 = vpop.f32.mrf.mxu3 }
 0x2d7   : > { %v4098_v56 = vadd.f32 %v951_v55, %v806_v54  ;;  %v4100_v63 = vpop.f32.mrf.mxu0  ;;  %v1807_v54 = vld [vmem:[#allocation2 + $0x30] sm:$0xff]  ;;  %v1808_v55 = vld [vmem:[#allocation2 + $0x38] sm:$0xff] }
 0x2d8   : > { %v1823_v41 = vpack.c.bf16 %v1807_v54, %v1807_v54  ;;  %v1811_v54 = vld [vmem:[#allocation2 + $0x60] sm:$0xff] }
 0x2d9   : > { %v4102_v42 = vpop.f32.mrf.mxu1 }
 0x2da   : > { %v1872_v13 = vunpack.c.l.b16 %v1823_v41 }
 0x2dd   : > { %v808_v3 = vpop.f32.mrf.mxu2 }
 0x2de   : > { %v953_v4 = vpop.f32.mrf.mxu3 }
 0x2df   : > { %v4104_v5 = vadd.f32 %v953_v4, %v808_v3  ;;  %v791_v7 = vpop.f32.mrf.mxu0  ;;  %v1824_v4 = vpack.c.bf16 %v1808_v55, %v1808_v55  ;;  %v1812_v55 = vld [vmem:[#allocation2 + $0x68] sm:$0xff] }
 0x2e0   : > { %v1828_v41 = vpack.c.bf16 %v1812_v55, %v1812_v55  ;;  %v3351_v55 = vld [vmem:[%s4473_s11 + $0x20] sm:$0xff] }
 0x2e1   : > { %v936_v8 = vpop.f32.mrf.mxu1  ;;  %v1873_v14 = vunpack.c.l.b16 %v1824_v4 }
 0x2e2   : > { %v4108_v9 = vadd.f32 %v936_v8, %v791_v7  ;;  %1149 = vmatmul.bf16.gmra.mxu2 %v4090_v47  ;;  %1569 = vmatmul.bf16.gmra.mxu0 %v4043_v16  ;;  %v2033_v7 = vpack.c.bf16 %v2017_v57, %v2017_v57  ;;  %v2034_v8 = vpack.c.bf16 %v2018_v62, %v2018_v62  ;;  %v2021_v57 = vld [vmem:[#allocation2 + $0x61] sm:$0xff]  ;;  %v2022_v62 = vld [vmem:[#allocation2 + $0x69] sm:$0xff] }
 0x2e3   : > { %1359 = vmatmul.bf16.gmra.mxu3 %v4045_v19  ;;  %v1627_v19 = vpack.c.bf16 %v1611_v22, %v1611_v22  ;;  %v1888_v18 = vpack.c.b16 %v1873_v14, %v1872_v13  ;;  %v2037_v4 = vpack.c.bf16 %v2021_v57, %v2021_v57 }
 0x2e4   : > { %1779 = vmatmul.bf16.gmra.mxu1 %v4106_v6  ;;  %v2082_v15 = vunpack.c.l.b16 %v2033_v7  ;;  %v2083_v22 = vunpack.c.l.b16 %v2034_v8  ;;  %v2038_v7 = vpack.c.bf16 %v2022_v62, %v2022_v62 }
 0x2e5   : > { %v811_v23 = vpop.f32.mrf.mxu2  ;;  %v1676_v40 = vunpack.c.l.b16 %v1627_v19  ;;  %v2086_v14 = vunpack.c.l.b16 %v2037_v4 }
 0x2e6   : > { %v956_v24 = vpop.f32.mrf.mxu3  ;;  %v2098_v17 = vpack.c.b16 %v2083_v22, %v2082_v15  ;;  %v2087_v15 = vunpack.c.l.b16 %v2038_v7  ;;  %v934_v22 = vadd.f32 %v4102_v42, %v4100_v63 }
 0x2e7   : > { %v4114_v25 = vadd.f32 %v956_v24, %v811_v23  ;;  %v4116_v32 = vpop.f32.mrf.mxu0  ;;  %v4126_v51 = vpack.c.b16 %v1676_v40, %v1675_v59  ;;  %v929_v40 = vadd.f32 %v4086_v39, %v4084_v38  ;;  %v1827_v38 = vpack.c.bf16 %v1811_v54, %v1811_v54 }
 0x2e9   : > { %v4118_v16 = vpop.f32.mrf.mxu1  ;;  %v1876_v12 = vunpack.c.l.b16 %v1827_v38 }
 0x2ea   : > { %v939_v38 = vadd.f32 %v4118_v16, %v4116_v32 }
 0x2ed   : > { %v813_v58 = vpop.f32.mrf.mxu2 }
 0x2ee   : > { %v958_v44 = vpop.f32.mrf.mxu3 }
 0x2ef   : > { %v4120_v45 = vadd.f32 %v958_v44, %v813_v58  ;;  %v796_v61 = vpop.f32.mrf.mxu0 }
 0x2f1   : > { %v941_v60 = vpop.f32.mrf.mxu1 }
 0x2f2   : > { %v4128_v53 = vadd.f32 %v941_v60, %v796_v61  ;;  %1154 = vmatmul.bf16.gmra.mxu2 %v4106_v6  ;;  %1574 = vmatmul.bf16.gmra.mxu0 %v4124_v49 }
 0x2f3   : > { %1364 = vmatmul.bf16.gmra.mxu3 %v4122_v48 }
 0x2f4   : > { %1784 = vmatmul.bf16.gmra.mxu1 %v4126_v51 }
 0x2f5   : > { %v816_v28 = vpop.f32.mrf.mxu2 }
 0x2f6   : > { %v961_v43 = vpop.f32.mrf.mxu3 }
 0x2f7   : > { %v4134_v3 = vadd.f32 %v961_v43, %v816_v28  ;;  %v4136_v11 = vpop.f32.mrf.mxu0 }
 0x2fd   : > { %v818_v23 = vpop.f32.mrf.mxu2 }
 0x2fe   : > { %v963_v24 = vpop.f32.mrf.mxu3 }
 0x2ff   : > { %v4141_v27 = vadd.f32 %v963_v24, %v818_v23  ;;  %v1540_v30 = vpop.f32.mrf.mxu0 }
 0x302   : > { %1960 = vmatmul.bf16.vlgmr.msra.gmra.mxu2 %v1888_v18  ;;  %2380 = vmatmul.bf16.vlgmr.msra.gmra.mxu0 %v4057_v52 }
 0x303   : > { %2170 = vmatmul.bf16.vlgmr.msra.gmra.mxu3 %v2098_v17  ;;  %v2100_v17 = vpack.c.b16 %v2087_v15, %v2086_v14  ;;  %v2025_v14 = vld [vmem:[#allocation2 + $0x91] sm:$0xff]  ;;  %v2026_v15 = vld [vmem:[#allocation2 + $0x99] sm:$0xff] }
 0x305   : > { %v1120_v31 = vpop.f32.mrf.mxu2 }
 0x306   : > { %v1330_v19 = vpop.f32.mrf.mxu3  ;;  %v1160_v33 = vadd.f32 %v1120_v31, %v4076_v29 }
 0x307   : > { %v1542_v36 = vpop.f32.mrf.mxu0 }
 0x308   : > { %v1370_v34 = vadd.f32 %v1330_v19, %v1160_v33  ;;  %v1813_v33 = vld [vmem:[#allocation2 + $0x78] sm:$0xff] }
 0x309   : > { %v1829_v63 = vpack.c.bf16 %v1813_v33, %v1813_v33  ;;  %v943_v33 = vpop.f32.mrf.mxu1 }
 0x30a   : > { %v4148_v59 = vadd.f32 %v1540_v30, %v1370_v34  ;;  %v1814_v34 = vld [vmem:[#allocation2 + $0x80] sm:$0xff] }
 0x30b   : > { %v1878_v57 = vunpack.c.l.b16 %v1829_v63 }
 0x30d   : > { %v1122_v58 = vpop.f32.mrf.mxu2 }
 0x30e   : > { %v1332_v44 = vpop.f32.mrf.mxu3  ;;  %v1161_v61 = vadd.f32 %v1122_v58, %v929_v40 }
 0x30f   : > { %v1545_v60 = vpop.f32.mrf.mxu0 }
 0x310   : > { %v1371_v52 = vadd.f32 %v1332_v44, %v1161_v61  ;;  %v1830_v44 = vpack.c.bf16 %v1814_v34, %v1814_v34 }
 0x312   : > { %1965 = vmatmul.bf16.gmra.mxu2 %v4049_v21  ;;  %v4154_v29 = vadd.f32 %v1542_v36, %v1371_v52  ;;  %2385 = vmatmul.bf16.gmra.mxu0 %v4062_v0  ;;  %v1877_v0 = vunpack.c.l.b16 %v1828_v41  ;;  %v2023_v36 = vld [vmem:[#allocation2 + $0x79] sm:$0xff]  ;;  %v2040_v52 = vpack.c.bf16 %v2024_v37, %v2024_v37 }
 0x313   : > { %2175 = vmatmul.bf16.gmra.mxu3 %v4047_v20  ;;  %v3352_v20 = vld [vmem:[%s4473_s11 + $0x28] sm:$0xff]  ;;  %v2039_v61 = vpack.c.bf16 %v2023_v36, %v2023_v36 }
 0x314   : > { %2545 = vmatpush.bf16.msra.mxu1 %v3352_v20  ;;  %v1890_v18 = vpack.c.b16 %v1877_v0, %v1876_v12  ;;  %v1815_v12 = vld [vmem:[#allocation2 + $0x90] sm:$0xff]  ;;  %v1816_v0 = vld [vmem:[#allocation2 + $0x98] sm:$0xff] }
 0x315   : > { %v1125_v28 = vpop.f32.mrf.mxu2  ;;  %v1831_v32 = vpack.c.bf16 %v1815_v12, %v1815_v12 }
 0x316   : > { %v1335_v43 = vpop.f32.mrf.mxu3  ;;  %v1162_v39 = vadd.f32 %v1125_v28, %v4092_v50  ;;  %v2088_v28 = vunpack.c.l.b16 %v2039_v61 }
 0x317   : > { %v1547_v21 = vpop.f32.mrf.mxu0  ;;  %v1880_v34 = vunpack.c.l.b16 %v1831_v32 }
 0x318   : > { %v1372_v8 = vadd.f32 %v1335_v43, %v1162_v39  ;;  %v2089_v43 = vunpack.c.l.b16 %v2040_v52  ;;  %2546 = vmatpush.bf16.msra.mxu1 %v3351_v55  ;;  %v1817_v55 = vld [vmem:[#allocation2 + $0xa8] sm:$0xff] }
 0x31a   : > { %v4161_v13 = vadd.f32 %v1545_v60, %v1372_v8  ;;  %v2101_v7 = vpack.c.b16 %v2089_v43, %v2088_v28  ;;  %v2028_v28 = vld [vmem:[#allocation2 + $0xb1] sm:$0xff] }
 0x31d   : > { %v1127_v50 = vpop.f32.mrf.mxu2 }
 0x31e   : > { %v1337_v23 = vpop.f32.mrf.mxu3  ;;  %v1163_v24 = vadd.f32 %v1127_v50, %v934_v22 }
 0x31f   : > { %v1550_v31 = vpop.f32.mrf.mxu0 }
 0x320   : > { %v1373_v30 = vadd.f32 %v1337_v23, %v1163_v24  ;;  %v1832_v23 = vpack.c.bf16 %v1816_v0, %v1816_v0  ;;  %v2041_v24 = vpack.c.bf16 %v2025_v14, %v2025_v14 }
 0x322   : > { %1970 = vmatmul.bf16.gmra.mxu2 %v1890_v18  ;;  %v4165_v19 = vadd.f32 %v1547_v21, %v1373_v30  ;;  %2390 = vmatmul.bf16.gmra.mxu0 %v4068_v10  ;;  %v1879_v10 = vunpack.c.l.b16 %v1830_v44  ;;  %v2042_v18 = vpack.c.bf16 %v2026_v15, %v2026_v15  ;;  %v1881_v36 = vunpack.c.l.b16 %v1832_v23 }
 0x323   : > { %2180 = vmatmul.bf16.gmra.mxu3 %v2100_v17  ;;  %v2090_v37 = vunpack.c.l.b16 %v2041_v24 }
 0x324   : > { %v1891_v4 = vpack.c.b16 %v1879_v10, %v1878_v57  ;;  %v1892_v44 = vpack.c.b16 %v1881_v36, %v1880_v34  ;;  %v1818_v57 = vld [vmem:[#allocation2 + $0xb0] sm:$0xff] }
 0x325   : > { %v1130_v40 = vpop.f32.mrf.mxu2  ;;  %v2027_v10 = vld [vmem:[#allocation2 + $0xa9] sm:$0xff] }
 0x326   : > { %v1340_v58 = vpop.f32.mrf.mxu3  ;;  %v1164_v42 = vadd.f32 %v1130_v40, %v4108_v9  ;;  %v2091_v40 = vunpack.c.l.b16 %v2042_v18 }
 0x327   : > { %v1552_v54 = vpop.f32.mrf.mxu0 }
 0x328   : > { %v1374_v60 = vadd.f32 %v1340_v58, %v1164_v42  ;;  %v944_v58 = vadd.f32 %v943_v33, %v4136_v11  ;;  %v2102_v61 = vpack.c.b16 %v2091_v40, %v2090_v37  ;;  %v1833_v11 = vpack.c.bf16 %v1817_v55, %v1817_v55  ;;  %v2242_v55 = vld [vmem:[#allocation2 + $0xe2] sm:$0xff] }
 0x32a   : > { %v4172_v62 = vadd.f32 %v1550_v31, %v1374_v60  ;;  %v3350_v31 = vld [vmem:[%s4473_s11 + $0x18] sm:$0xff]  ;;  %v1882_v12 = vunpack.c.l.b16 %v1833_v11 }
 0x32b   : > { %2547 = vmatpush.bf16.msra.mxu1 %v3350_v31 }
 0x32d   : > { %v1132_v9 = vpop.f32.mrf.mxu2 }
 0x32e   : > { %v1342_v39 = vpop.f32.mrf.mxu3  ;;  %v1165_v41 = vadd.f32 %v1132_v9, %v939_v38 }
 0x32f   : > { %v1555_v21 = vpop.f32.mrf.mxu0 }
 0x330   : > { %v1375_v8 = vadd.f32 %v1342_v39, %v1165_v41  ;;  %v1834_v39 = vpack.c.bf16 %v1818_v57, %v1818_v57  ;;  %v2043_v41 = vpack.c.bf16 %v2027_v10, %v2027_v10 }
 0x332   : > { %1975 = vmatmul.bf16.gmra.mxu2 %v1891_v4  ;;  %v4176_v20 = vadd.f32 %v1552_v54, %v1375_v8  ;;  %2395 = vmatmul.bf16.gmra.mxu0 %v4074_v26  ;;  %v2044_v4 = vpack.c.bf16 %v2028_v28, %v2028_v28  ;;  %v2092_v14 = vunpack.c.l.b16 %v2043_v41 }
 0x333   : > { %2185 = vmatmul.bf16.gmra.mxu3 %v2101_v7 }
 0x334   : > { %v2093_v15 = vunpack.c.l.b16 %v2044_v4 }
 0x335   : > { %v1135_v22 = vpop.f32.mrf.mxu2 }
 0x336   : > { %v1345_v50 = vpop.f32.mrf.mxu3  ;;  %v1166_v16 = vadd.f32 %v1135_v22, %v4128_v53 }
 0x337   : > { %v1557_v30 = vpop.f32.mrf.mxu0 }
 0x338   : > { %v1376_v17 = vadd.f32 %v1345_v50, %v1166_v16  ;;  %v2103_v16 = vpack.c.b16 %v2093_v15, %v2092_v14 }
 0x33a   : > { %v4183_v26 = vadd.f32 %v1555_v21, %v1376_v17  ;;  %v3349_v21 = vld [vmem:[%s4473_s11 + $0x10] sm:$0xff] }
 0x33b   : > { %2548 = vmatpush.bf16.msra.mxu1 %v3349_v21 }
 0x33d   : > { %v1137_v53 = vpop.f32.mrf.mxu2 }
 0x33e   : > { %v1347_v63 = vpop.f32.mrf.mxu3  ;;  %v1167_v42 = vadd.f32 %v1137_v53, %v944_v58 }
 0x33f   : > { %v1560_v60 = vpop.f32.mrf.mxu0 }
 0x340   : > { %v1377_v52 = vadd.f32 %v1347_v63, %v1167_v42  ;;  %v1821_v42 = vld [vmem:[#allocation2 + $0xd8] sm:$0xff] }
 0x342   : > { %1980 = vmatmul.bf16.gmra.mxu2 %v1892_v44  ;;  %v4186_v54 = vadd.f32 %v1557_v30, %v1377_v52  ;;  %2400 = vmatmul.bf16.gmra.mxu0 %v4090_v47  ;;  %v1883_v47 = vunpack.c.l.b16 %v1834_v39  ;;  %v1822_v44 = vld [vmem:[#allocation2 + $0xe0] sm:$0xff] }
 0x343   : > { %2190 = vmatmul.bf16.gmra.mxu3 %v2102_v61  ;;  %v2031_v61 = vld [vmem:[#allocation2 + $0xd9] sm:$0xff]  ;;  %v2032_v52 = vld [vmem:[#allocation2 + $0xe1] sm:$0xff] }
 0x344   : > { %v1893_v32 = vpack.c.b16 %v1883_v47, %v1882_v12 }
 0x345   : > { %v1140_v43 = vpop.f32.mrf.mxu2 }
 0x346   : > { %v1350_v38 = vpop.f32.mrf.mxu3  ;;  %v1168_v9 = vadd.f32 %v1140_v43, %v4082_v35  ;;  %v1838_v43 = vpack.c.bf16 %v1822_v44, %v1822_v44 }
 0x347   : > { %v1562_v8 = vpop.f32.mrf.mxu0 }
 0x348   : > { %v1378_v7 = vadd.f32 %v1350_v38, %v1168_v9  ;;  %v2047_v38 = vpack.c.bf16 %v2031_v61, %v2031_v61 }
 0x34a   : > { %v4193_v0 = vadd.f32 %v1560_v60, %v1378_v7  ;;  %v2241_v60 = vld [vmem:[#allocation2 + $0xda] sm:$0xff]  ;;  %v2096_v7 = vunpack.c.l.b16 %v2047_v38 }
 0x34b   : > { %v2257_v11 = vpack.c.bf16 %v2241_v60, %v2241_v60 }
 0x34d   : > { %v1142_v22 = vpop.f32.mrf.mxu2  ;;  %v2306_v21 = vunpack.c.l.b16 %v2257_v11 }
 0x34e   : > { %v1352_v50 = vpop.f32.mrf.mxu3  ;;  %v1169_v35 = vadd.f32 %v1142_v22, %v4088_v46  ;;  %v3348_v46 = vld [vmem:[%s4473_s11 + $0x8] sm:$0xff] }
 0x34f   : > { %v1565_v24 = vpop.f32.mrf.mxu0  ;;  %2549 = vmatpush.bf16.msra.mxu1 %v3348_v46 }
 0x350   : > { %v1379_v23 = vadd.f32 %v1352_v50, %v1169_v35  ;;  %v3347_v35 = vld [vmem:[%s4473_s11] sm:$0xff] }
 0x352   : > { %1985 = vmatmul.bf16.gmra.mxu2 %v1893_v32  ;;  %v4196_v18 = vadd.f32 %v1562_v8, %v1379_v23  ;;  %2405 = vmatmul.bf16.gmra.mxu0 %v4106_v6  ;;  %v1750_v6 = vpop.f32.mrf.mxu1 }
 0x353   : > { %2195 = vmatmul.bf16.gmra.mxu3 %v2103_v16  ;;  %2550 = vmatpush.bf16.msra.mxu1 %v3347_v35  ;;  %v1790_v61 = vadd.f32 %v1750_v6, %v4148_v59 }
 0x355   : > { %v1145_v17 = vpop.f32.mrf.mxu2 }
 0x356   : > { %v1355_v30 = vpop.f32.mrf.mxu3  ;;  %v1170_v31 = vadd.f32 %v1145_v17, %v4098_v56 }
 0x357   : > { %v1567_v34 = vpop.f32.mrf.mxu0 }
 0x358   : > { %v1380_v33 = vadd.f32 %v1355_v30, %v1170_v31 }
 0x35a   : > { %v4203_v36 = vadd.f32 %v1565_v24, %v1380_v33  ;;  %v1752_v47 = vpop.f32.mrf.mxu1 }
 0x35d   : > { %v1147_v37 = vpop.f32.mrf.mxu2 }
 0x35e   : > { %v1357_v40 = vpop.f32.mrf.mxu3  ;;  %v1171_v58 = vadd.f32 %v1147_v37, %v4104_v5  ;;  %v1837_v5 = vpack.c.bf16 %v1821_v42, %v1821_v42 }
 0x35f   : > { %v1570_v63 = vpop.f32.mrf.mxu0 }
 0x360   : > { %v1381_v53 = vadd.f32 %v1357_v40, %v1171_v58  ;;  %v1886_v41 = vunpack.c.l.b16 %v1837_v5  ;;  %v1791_v5 = vadd.f32 %v1752_v47, %v4154_v29 }
 0x362   : > { %1990 = vmatmul.bf16.gmra.mxu2 %v4122_v48  ;;  %v4208_v56 = vadd.f32 %v1567_v34, %v1381_v53  ;;  %2410 = vmatmul.bf16.gmra.mxu0 %v4126_v51  ;;  %v2048_v48 = vpack.c.bf16 %v2032_v52, %v2032_v52  ;;  %v1887_v51 = vunpack.c.l.b16 %v1838_v43  ;;  %v1755_v31 = vpop.f32.mrf.mxu1 }
 0x363   : > { %2200 = vmatmul.bf16.gmra.mxu3 %v4124_v49  ;;  %v2258_v49 = vpack.c.bf16 %v2242_v55, %v2242_v55  ;;  %v1792_v6 = vadd.f32 %v1755_v31, %v4161_v13 }
 0x364   : > { %v2097_v8 = vunpack.c.l.b16 %v2048_v48  ;;  %v1895_v22 = vpack.c.b16 %v1887_v51, %v1886_v41 }
 0x365   : > { %v1150_v57 = vpop.f32.mrf.mxu2  ;;  %v2307_v12 = vunpack.c.l.b16 %v2258_v49 }
 0x366   : > { %v1360_v10 = vpop.f32.mrf.mxu3  ;;  %v1172_v28 = vadd.f32 %v1150_v57, %v4114_v25  ;;  %v2105_v50 = vpack.c.b16 %v2097_v8, %v2096_v7 }
 0x367   : > { %v1572_v39 = vpop.f32.mrf.mxu0  ;;  %v2315_v32 = vpack.c.b16 %v2307_v12, %v2306_v21 }
 0x368   : > { %v1382_v9 = vadd.f32 %v1360_v10, %v1172_v28 }
 0x36a   : > { %v4212_v4 = vadd.f32 %v1570_v63, %v1382_v9  ;;  %v1757_v53 = vpop.f32.mrf.mxu1 }
 0x36d   : > { %v1152_v14 = vpop.f32.mrf.mxu2 }
 0x36e   : > { %v1362_v15 = vpop.f32.mrf.mxu3  ;;  %v1173_v25 = vadd.f32 %v1152_v14, %v4120_v45  ;;  %v1793_v14 = vadd.f32 %v1757_v53, %v4165_v19 }
 0x36f   : > { %v1575_v23 = vpop.f32.mrf.mxu0 }
 0x370   : > { %v1383_v16 = vadd.f32 %v1362_v15, %v1173_v25 }
 0x372   : > { %1995 = vmatmul.bf16.gmra.mxu2 %v1895_v22  ;;  %v4218_v24 = vadd.f32 %v1572_v39, %v1383_v16  ;;  %2415 = vmatmul.bf16.gmra.mxu0 %v2315_v32 }
 0x373   : > { %2205 = vmatmul.bf16.gmra.mxu3 %v2105_v50 }
 0x375   : > { %v1155_v17 = vpop.f32.mrf.mxu2 }
 0x376   : > { %v1365_v30 = vpop.f32.mrf.mxu3  ;;  %v1174_v45 = vadd.f32 %v1155_v17, %v4134_v3  ;;  %v1760_v3 = vpop.f32.mrf.mxu1 }
 0x377   : > { %v1577_v34 = vpop.f32.mrf.mxu0  ;;  %v1794_v17 = vadd.f32 %v1760_v3, %v4172_v62 }
 0x378   : > { %v1384_v33 = vadd.f32 %v1365_v30, %v1174_v45 }
 0x37a   : > { %v4221_v46 = vadd.f32 %v1575_v23, %v1384_v33 }
 0x37d   : > { %v1157_v37 = vpop.f32.mrf.mxu2 }
 0x37e   : > { %v1367_v40 = vpop.f32.mrf.mxu3  ;;  %v1175_v58 = vadd.f32 %v1157_v37, %v4141_v27  ;;  %v4229_v27 = vperm.slane %v3928_v1, 0  ;;  %v1762_v39 = vpop.f32.mrf.mxu1 }
 0x37f   : > { %v2381_v42 = vpop.f32.mrf.mxu0 }
 0x380   : > { %v1385_v63 = vadd.f32 %v1367_v40, %v1175_v58 }
 0x382   : > { %v4224_v44 = vadd.f32 %v1577_v34, %v1385_v63  ;;  %v1795_v63 = vadd.f32 %v1762_v39, %v4176_v20 }
 0x385   : > { %v1961_v52 = vpop.f32.mrf.mxu2 }
 0x386   : > { %v2171_v60 = vpop.f32.mrf.mxu3  ;;  %v2001_v55 = vadd.f32 %v1961_v52, %v1790_v61  ;;  %v1765_v22 = vpop.f32.mrf.mxu1 }
 0x387   : > { %v2383_v57 = vpop.f32.mrf.mxu0 }
 0x388   : > { %v2211_v10 = vadd.f32 %v2171_v60, %v2001_v55 }
 0x38a   : > { %v2421_v38 = vadd.f32 %v2381_v42, %v2211_v10 }
 0x38c   : > { %v2438_v9 = vadd.f32 %v4229_v27, %v2421_v38 }
 0x38d   : > { %v1963_v28 = vpop.f32.mrf.mxu2 }
 0x38e   : > { %v2173_v43 = vpop.f32.mrf.mxu3  ;;  %v2002_v48 = vadd.f32 %v1963_v28, %v1791_v5  ;;  %v2454_v29 = vmax.f32 %v2438_v9, 0.0  ;;  %v1767_v19 = vpop.f32.mrf.mxu1  ;;  %v1796_v5 = vadd.f32 %v1765_v22, %v4183_v26 }
 0x38f   : > { %v2386_v49 = vpop.f32.mrf.mxu0 }
 0x390   : > { %v2212_v11 = vadd.f32 %v2173_v43, %v2002_v48 }
 0x392   : > { %v2422_v59 = vadd.f32 %v2383_v57, %v2212_v11 }
 0x394   : > { %v2439_v41 = vadd.f32 %v4229_v27, %v2422_v59 }
 0x395   : > { %v1966_v51 = vpop.f32.mrf.mxu2 }
 0x396   : > { %v2176_v7 = vpop.f32.mrf.mxu3  ;;  %v2455_v8 = vmax.f32 %v2439_v41, 0.0  ;;  %v2003_v21 = vadd.f32 %v1966_v51, %v1792_v6  ;;  %v1770_v57 = vpop.f32.mrf.mxu1  ;;  %v1797_v6 = vadd.f32 %v1767_v19, %v4186_v54 }
 0x397   : > { %v2388_v47 = vpop.f32.mrf.mxu0 }
 0x398   : > { %v2470_v12 = vpack.c.bf16 %v2455_v8, %v2454_v29  ;;  %v2213_v1 = vadd.f32 %v2176_v7, %v2003_v21 }
 0x39a   : > { %2551 = vmatmul.bf16.vlgmr.msra.gmra.mxu1 %v2470_v12  ;;  %v2423_v50 = vadd.f32 %v2386_v49, %v2213_v1 }
 0x39c   : > { %v2440_v16 = vadd.f32 %v4229_v27, %v2423_v50 }
 0x39d   : > { %v1968_v15 = vpop.f32.mrf.mxu2 }
 0x39e   : > { %v2178_v25 = vpop.f32.mrf.mxu3  ;;  %v2004_v35 = vadd.f32 %v1968_v15, %v1793_v14  ;;  %v2456_v33 = vmax.f32 %v2440_v16, 0.0  ;;  %v1772_v39 = vpop.f32.mrf.mxu1 }
 0x39f   : > { %v2391_v32 = vpop.f32.mrf.mxu0  ;;  %v1799_v16 = vadd.f32 %v1772_v39, %v4196_v18 }
 0x3a0   : > { %v2214_v13 = vadd.f32 %v2178_v25, %v2004_v35 }
 0x3a2   : > { %v2424_v23 = vadd.f32 %v2388_v47, %v2214_v13  ;;  %v1798_v47 = vadd.f32 %v1770_v57, %v4193_v0 }
 0x3a4   : > { %v2441_v30 = vadd.f32 %v4229_v27, %v2424_v23 }
 0x3a5   : > { %v1971_v31 = vpop.f32.mrf.mxu2 }
 0x3a6   : > { %v2181_v45 = vpop.f32.mrf.mxu3  ;;  %v2457_v34 = vmax.f32 %v2441_v30, 0.0  ;;  %v2005_v37 = vadd.f32 %v1971_v31, %v1794_v17  ;;  %v1775_v25 = vpop.f32.mrf.mxu1 }
 0x3a7   : > { %v2393_v40 = vpop.f32.mrf.mxu0  ;;  %v1800_v19 = vadd.f32 %v1775_v25, %v4203_v36 }
 0x3a8   : > { %v2471_v58 = vpack.c.bf16 %v2457_v34, %v2456_v33  ;;  %v2215_v53 = vadd.f32 %v2181_v45, %v2005_v37 }
 0x3aa   : > { %2556 = vmatmul.bf16.gmra.mxu1 %v2471_v58  ;;  %v2425_v52 = vadd.f32 %v2391_v32, %v2215_v53 }
 0x3ac   : > { %v2442_v3 = vadd.f32 %v4229_v27, %v2425_v52 }
 0x3ad   : > { %v1973_v42 = vpop.f32.mrf.mxu2 }
 0x3ae   : > { %v2183_v61 = vpop.f32.mrf.mxu3  ;;  %v2006_v60 = vadd.f32 %v1973_v42, %v1795_v63  ;;  %v2458_v48 = vmax.f32 %v2442_v3, 0.0  ;;  %v1777_v45 = vpop.f32.mrf.mxu1 }
 0x3af   : > { %v2396_v62 = vpop.f32.mrf.mxu0 }
 0x3b0   : > { %v2216_v55 = vadd.f32 %v2183_v61, %v2006_v60 }
 0x3b2   : > { %v2426_v10 = vadd.f32 %v2393_v40, %v2216_v55 }
 0x3b4   : > { %v2443_v28 = vadd.f32 %v4229_v27, %v2426_v10 }
 0x3b5   : > { %v1976_v43 = vpop.f32.mrf.mxu2 }
 0x3b6   : > { %v2186_v38 = vpop.f32.mrf.mxu3  ;;  %v2459_v11 = vmax.f32 %v2443_v28, 0.0  ;;  %v2007_v49 = vadd.f32 %v1976_v43, %v1796_v5  ;;  %v1780_v60 = vpop.f32.mrf.mxu1 }
 0x3b7   : > { %v2398_v20 = vpop.f32.mrf.mxu0 }
 0x3b8   : > { %v2472_v9 = vpack.c.bf16 %v2459_v11, %v2458_v48  ;;  %v2217_v59 = vadd.f32 %v2186_v38, %v2007_v49  ;;  %v1802_v48 = vadd.f32 %v1780_v60, %v4212_v4 }
 0x3ba   : > { %2561 = vmatmul.bf16.gmra.mxu1 %v2472_v9  ;;  %v2427_v7 = vadd.f32 %v2396_v62, %v2217_v59  ;;  %v1801_v62 = vadd.f32 %v1777_v45, %v4208_v56 }
 0x3bc   : > { %v2444_v21 = vadd.f32 %v4229_v27, %v2427_v7 }
 0x3bd   : > { %v1978_v41 = vpop.f32.mrf.mxu2 }
 0x3be   : > { %v2188_v51 = vpop.f32.mrf.mxu3  ;;  %v2008_v29 = vadd.f32 %v1978_v41, %v1797_v6  ;;  %v2460_v22 = vmax.f32 %v2444_v21, 0.0  ;;  %v1782_v11 = vpop.f32.mrf.mxu1 }
 0x3bf   : > { %v2401_v26 = vpop.f32.mrf.mxu0 }
 0x3c0   : > { %v2218_v8 = vadd.f32 %v2188_v51, %v2008_v29  ;;  %v1803_v51 = vadd.f32 %v1782_v11, %v4218_v24 }
 0x3c2   : > { %v2428_v12 = vadd.f32 %v2398_v20, %v2218_v8 }
 0x3c4   : > { %v2445_v1 = vadd.f32 %v4229_v27, %v2428_v12 }
 0x3c5   : > { %v1981_v14 = vpop.f32.mrf.mxu2 }
 0x3c6   : > { %v2191_v15 = vpop.f32.mrf.mxu3  ;;  %v2461_v50 = vmax.f32 %v2445_v1, 0.0  ;;  %v2009_v54 = vadd.f32 %v1981_v14, %v1798_v47  ;;  %v1785_v12 = vpop.f32.mrf.mxu1 }
 0x3c7   : > { %v2403_v35 = vpop.f32.mrf.mxu0  ;;  %v1804_v14 = vadd.f32 %v1785_v12, %v4221_v46 }
 0x3c8   : > { %v2473_v13 = vpack.c.bf16 %v2461_v50, %v2460_v22  ;;  %v2219_v32 = vadd.f32 %v2191_v15, %v2009_v54 }
 0x3ca   : > { %2566 = vmatmul.bf16.gmra.mxu1 %v2473_v13  ;;  %v2429_v30 = vadd.f32 %v2401_v26, %v2219_v32 }
 0x3cc   : > { %v2446_v34 = vadd.f32 %v4229_v27, %v2429_v30 }
 0x3cd   : > { %v1983_v23 = vpop.f32.mrf.mxu2 }
 0x3ce   : > { %v2193_v17 = vpop.f32.mrf.mxu3  ;;  %v2010_v31 = vadd.f32 %v1983_v23, %v1799_v16  ;;  %v2462_v63 = vmax.f32 %v2446_v34, 0.0  ;;  %v1787_v32 = vpop.f32.mrf.mxu1 }
 0x3cf   : > { %v2406_v33 = vpop.f32.mrf.mxu0  ;;  %v1805_v23 = vadd.f32 %v1787_v32, %v4224_v44  ;;  %v4262_v44 = vperm.slane %v3933_v2, 0  ;;  %v2609_v2 = vld [vmem:[%s3923_s10 + $0x8] sm:$0xff] }
 0x3d0   : > { %v2220_v0 = vadd.f32 %v2193_v17, %v2010_v31 }
 0x3d2   : > { %v2430_v37 = vadd.f32 %v2403_v35, %v2220_v0 }
 0x3d4   : > { %v2447_v40 = vadd.f32 %v4229_v27, %v2430_v37 }
 0x3d5   : > { %v1986_v58 = vpop.f32.mrf.mxu2 }
 0x3d6   : > { %v2196_v53 = vpop.f32.mrf.mxu3  ;;  %v2463_v42 = vmax.f32 %v2447_v40, 0.0  ;;  %v2011_v61 = vadd.f32 %v1986_v58, %v1800_v19 }
 0x3d7   : > { %v2408_v18 = vpop.f32.mrf.mxu0 }
 0x3d8   : > { %v2474_v52 = vpack.c.bf16 %v2463_v42, %v2462_v63  ;;  %v2221_v55 = vadd.f32 %v2196_v53, %v2011_v61  ;;  %v2608_v42 = vld [vmem:[%s3923_s10] sm:$0xff] }
 0x3da   : > { %2571 = vmatmul.bf16.gmra.mxu1 %v2474_v52  ;;  %v2431_v10 = vadd.f32 %v2406_v33, %v2221_v55 }
 0x3dc   : > { %v2448_v36 = vadd.f32 %v4229_v27, %v2431_v10 }
 0x3dd   : > { %v1988_v57 = vpop.f32.mrf.mxu2 }
 0x3de   : > { %v2198_v3 = vpop.f32.mrf.mxu3  ;;  %v2012_v5 = vadd.f32 %v1988_v57, %v1801_v62  ;;  %v2464_v59 = vmax.f32 %v2448_v36, 0.0  ;;  %v2610_v36 = vld [vmem:[%s3923_s10 + $0x10] sm:$0xff] }
 0x3df   : > { %v2411_v38 = vpop.f32.mrf.mxu0 }
 0x3e0   : > { %v2222_v28 = vadd.f32 %v2198_v3, %v2012_v5 }
 0x3e2   : > { %v2432_v43 = vadd.f32 %v2408_v18, %v2222_v28 }
 0x3e4   : > { %v2449_v49 = vadd.f32 %v4229_v27, %v2432_v43 }
 0x3e5   : > { %v1991_v20 = vpop.f32.mrf.mxu2 }
 0x3e6   : > { %v2201_v9 = vpop.f32.mrf.mxu3  ;;  %v2465_v6 = vmax.f32 %v2449_v49, 0.0  ;;  %v2013_v39 = vadd.f32 %v1991_v20, %v1802_v48 }
 0x3e7   : > { %v2413_v7 = vpop.f32.mrf.mxu0 }
 0x3e8   : > { %v2475_v56 = vpack.c.bf16 %v2465_v6, %v2464_v59  ;;  %v2223_v41 = vadd.f32 %v2201_v9, %v2013_v39  ;;  %v2611_v9 = vld [vmem:[%s3923_s10 + $0x18] sm:$0xff] }
 0x3ea   : > { %2576 = vmatmul.bf16.gmra.mxu1 %v2475_v56  ;;  %v2433_v26 = vadd.f32 %v2411_v38, %v2223_v41 }
 0x3ec   : > { %v2450_v47 = vadd.f32 %v4229_v27, %v2433_v26 }
 0x3ed   : > { %v1993_v29 = vpop.f32.mrf.mxu2 }
 0x3ee   : > { %v2203_v8 = vpop.f32.mrf.mxu3  ;;  %v2014_v21 = vadd.f32 %v1993_v29, %v1803_v51  ;;  %v2466_v50 = vmax.f32 %v2450_v47, 0.0  ;;  %v2613_v47 = vld [vmem:[%s3923_s10 + $0x28] sm:$0xff] }
 0x3ef   : > { %v2416_v24 = vpop.f32.mrf.mxu0 }
 0x3f0   : > { %v2224_v4 = vadd.f32 %v2203_v8, %v2014_v21 }
 0x3f2   : > { %v2434_v1 = vadd.f32 %v2413_v7, %v2224_v4  ;;  %v2612_v7 = vld [vmem:[%s3923_s10 + $0x20] sm:$0xff] }
 0x3f4   : > { %v2451_v15 = vadd.f32 %v4229_v27, %v2434_v1 }
 0x3f5   : > { %v1996_v25 = vpop.f32.mrf.mxu2 }
 0x3f6   : > { %v2206_v22 = vpop.f32.mrf.mxu3  ;;  %v2467_v54 = vmax.f32 %v2451_v15, 0.0  ;;  %v2015_v35 = vadd.f32 %v1996_v25, %v1804_v14 }
 0x3f7   : > { %v2418_v0 = vpop.f32.mrf.mxu0 }
 0x3f8   : > { %v2476_v13 = vpack.c.bf16 %v2467_v54, %v2466_v50  ;;  %v2225_v16 = vadd.f32 %v2206_v22, %v2015_v35  ;;  %v2614_v54 = vld [vmem:[%s3923_s10 + $0x30] sm:$0xff] }
 0x3fa   : > { %2581 = vmatmul.bf16.gmra.mxu1 %v2476_v13  ;;  %v2435_v30 = vadd.f32 %v2416_v24, %v2225_v16 }
 0x3fc   : > { %v2452_v33 = vadd.f32 %v4229_v27, %v2435_v30 }
 0x3fd   : > { %v1998_v17 = vpop.f32.mrf.mxu2 }
 0x3fe   : > { %v2016_v31 = vadd.f32 %v1998_v17, %v1805_v23  ;;  %v2208_v45 = vpop.f32.mrf.mxu3  ;;  %v2468_v19 = vmax.f32 %v2452_v33, 0.0  ;;  %v2615_v17 = vld [vmem:[%s3923_s10 + $0x38] sm:$0xff] }
 0x400   : > { %v2226_v46 = vadd.f32 %v2208_v45, %v2016_v31 }
 0x402   : > { %v2436_v34 = vadd.f32 %v2418_v0, %v2226_v46 }
 0x404   : > { %v2453_v37 = vadd.f32 %v4229_v27, %v2436_v34  ;;  %v2616_v34 = vld [vmem:[%s3923_s10 + $0x40] sm:$0xff] }
 0x406   : > { %v2469_v40 = vmax.f32 %v2453_v37, 0.0 }
 0x408   : > { %v2477_v58 = vpack.c.bf16 %v2469_v40, %v2468_v19 }
 0x40a   : > { %2586 = vmatmul.bf16.gmra.mxu1 %v2477_v58 }
 0x417   : > { %v2552_v53 = vpop.f32.mrf.mxu1 }
 0x418   : > { %v2553_v63 = vadd.f32 %v2552_v53, %v4262_v44 }
 0x41a   : > { %v2592_v61 = vmax.f32 %v2553_v63, 0.0 }
 0x41c   : > { %v2624_v18 = vadd.f32 %v2608_v42, %v2592_v61  ;;  %v2617_v42 = vld [vmem:[%s3923_s10 + $0x48] sm:$0xff] }
 0x41e   : > { %2640 = vst.msk [vmem:[%s3989_s15] sm:$0xff] %vm378_vm0, %v2624_v18  ;;  %v2656_v27 = vmax.f32 %v2624_v18, 0.0 }
 0x41f   : > { %v2554_v52 = vpop.f32.mrf.mxu1 }
 0x420   : > { %v2672_v60 = vpack.c.bf16 %v2656_v27, %v2656_v27  ;;  %v2555_v55 = vadd.f32 %v2554_v52, %v4262_v44 }
 0x422   : > { %2689 = vst.msk [vmem:[%s3985_s2] sm:$0xf] %vm2688_vm1, %v2672_v60  ;;  %v2593_v62 = vmax.f32 %v2555_v55, 0.0 }
 0x424   : > { %v2625_v57 = vadd.f32 %v2609_v2, %v2593_v62  ;;  %v2618_v2 = vld [vmem:[%s3923_s10 + $0x50] sm:$0xff] }
 0x426   : > { %2641 = vst.msk [vmem:[%s3989_s15 + $0x8] sm:$0xff] %vm378_vm0, %v2625_v57  ;;  %v2657_v3 = vmax.f32 %v2625_v57, 0.0 }
 0x427   : > { %v2557_v10 = vpop.f32.mrf.mxu1 }
 0x428   : > { %v2673_v5 = vpack.c.bf16 %v2657_v3, %v2657_v3  ;;  %v2558_v28 = vadd.f32 %v2557_v10, %v4262_v44 }
 0x42a   : > { %2690 = vst.msk [vmem:[%s3985_s2 + $0x4] sm:$0xf] %vm2688_vm1, %v2673_v5  ;;  %v2594_v43 = vmax.f32 %v2558_v28, 0.0 }
 0x42c   : > { %v2626_v38 = vadd.f32 %v2610_v36, %v2594_v43  ;;  %v2619_v36 = vld [vmem:[%s3923_s10 + $0x58] sm:$0xff] }
 0x42e   : > { %2642 = vst.msk [vmem:[%s3989_s15 + $0x10] sm:$0xff] %vm378_vm0, %v2626_v38  ;;  %v2658_v48 = vmax.f32 %v2626_v38, 0.0 }
 0x42f   : > { %v2559_v11 = vpop.f32.mrf.mxu1 }
 0x430   : > { %v2674_v49 = vpack.c.bf16 %v2658_v48, %v2658_v48  ;;  %v2560_v20 = vadd.f32 %v2559_v11, %v4262_v44 }
 0x432   : > { %2691 = vst.msk [vmem:[%s3985_s2 + $0x8] sm:$0xf] %vm2688_vm1, %v2674_v49  ;;  %v2595_v59 = vmax.f32 %v2560_v20, 0.0 }
 0x434   : > { %v2627_v6 = vadd.f32 %v2611_v9, %v2595_v59  ;;  %v2620_v9 = vld [vmem:[%s3923_s10 + $0x60] sm:$0xff] }
 0x436   : > { %2643 = vst.msk [vmem:[%s3989_s15 + $0x18] sm:$0xff] %vm378_vm0, %v2627_v6  ;;  %v2659_v39 = vmax.f32 %v2627_v6, 0.0 }
 0x437   : > { %v2562_v56 = vpop.f32.mrf.mxu1 }
 0x438   : > { %v2675_v41 = vpack.c.bf16 %v2659_v39, %v2659_v39  ;;  %v2563_v51 = vadd.f32 %v2562_v56, %v4262_v44 }
 0x43a   : > { %2692 = vst.msk [vmem:[%s3985_s2 + $0xc] sm:$0xf] %vm2688_vm1, %v2675_v41  ;;  %v2596_v29 = vmax.f32 %v2563_v51, 0.0 }
 0x43c   : > { %v2628_v8 = vadd.f32 %v2612_v7, %v2596_v29  ;;  %v2621_v7 = vld [vmem:[%s3923_s10 + $0x68] sm:$0xff] }
 0x43e   : > { %2644 = vst.msk [vmem:[%s3989_s15 + $0x20] sm:$0xff] %vm378_vm0, %v2628_v8  ;;  %v2660_v26 = vmax.f32 %v2628_v8, 0.0 }
 0x43f   : > { %v2564_v21 = vpop.f32.mrf.mxu1 }
 0x440   : > { %v2676_v12 = vpack.c.bf16 %v2660_v26, %v2660_v26  ;;  %v2565_v4 = vadd.f32 %v2564_v21, %v4262_v44 }
 0x442   : > { %2693 = vst.msk [vmem:[%s3985_s2 + $0x10] sm:$0xf] %vm2688_vm1, %v2676_v12  ;;  %v2597_v1 = vmax.f32 %v2565_v4, 0.0 }
 0x444   : > { %v2629_v14 = vadd.f32 %v2613_v47, %v2597_v1  ;;  %v2622_v47 = vld [vmem:[%s3923_s10 + $0x70] sm:$0xff] }
 0x446   : > { %2645 = vst.msk [vmem:[%s3989_s15 + $0x28] sm:$0xff] %vm378_vm0, %v2629_v14  ;;  %v2661_v15 = vmax.f32 %v2629_v14, 0.0 }
 0x447   : > { %v2567_v25 = vpop.f32.mrf.mxu1 }
 0x448   : > { %v2677_v22 = vpack.c.bf16 %v2661_v15, %v2661_v15  ;;  %v2568_v50 = vadd.f32 %v2567_v25, %v4262_v44 }
 0x44a   : > { %2694 = vst.msk [vmem:[%s3985_s2 + $0x14] sm:$0xf] %vm2688_vm1, %v2677_v22  ;;  %v2598_v35 = vmax.f32 %v2568_v50, 0.0 }
 0x44c   : > { %v2630_v24 = vadd.f32 %v2614_v54, %v2598_v35  ;;  %v2623_v54 = vld [vmem:[%s3923_s10 + $0x78] sm:$0xff]  ;;  %s3582_s10 = scalar_lea.hbm %s3581_s27, 128 }
 0x44d   : > { %p3583_p2 = scmp.ne.s32.totalorder %s3581_s27, %s3582_s10  ;;  %p3588_p8 = scmp.lt.s32.totalorder %s3586_s9, %s3582_s10 }
 0x44e   : > { %2646 = vst.msk [vmem:[%s3989_s15 + $0x30] sm:$0xff] %vm378_vm0, %v2630_v24  ;;  %v2662_v13 = vmax.f32 %v2630_v24, 0.0 }
 0x44f   : > { %v2569_v32 = vpop.f32.mrf.mxu1  ;;  %p3584_p3 = pnand %p3583_p2, %p3843_p6  ;;  %p3589_p9 = por %p3588_p8, %p3587_p7 }
 0x450   : > { %v2678_v16 = vpack.c.bf16 %v2662_v13, %v2662_v13  ;;  %v2570_v23 = vadd.f32 %v2569_v32, %v4262_v44 }
 0x451   : > { %p3585_p5 = pneg %p3584_p3 }
 0x452   : > { %2695 = vst.msk [vmem:[%s3985_s2 + $0x18] sm:$0xf] %vm2688_vm1, %v2678_v16  ;;  %v2599_v30 = vmax.f32 %v2570_v23, 0.0 }
 0x453   : > { %p3590_p12 = pnand %p3589_p9, %p3585_p5 }
 0x454   : > { %v2631_v31 = vadd.f32 %v2615_v17, %v2599_v30 }
 0x456   : > { %2647 = vst.msk [vmem:[%s3989_s15 + $0x38] sm:$0xff] %vm378_vm0, %v2631_v31  ;;  %v2663_v45 = vmax.f32 %v2631_v31, 0.0 }
 0x457   : > { %v2572_v46 = vpop.f32.mrf.mxu1 }
 0x458   : > { %v2679_v0 = vpack.c.bf16 %v2663_v45, %v2663_v45  ;;  %v2573_v33 = vadd.f32 %v2572_v46, %v4262_v44 }
 0x45a   : > { %2696 = vst.msk [vmem:[%s3985_s2 + $0x1c] sm:$0xf] %vm2688_vm1, %v2679_v0  ;;  %v2600_v37 = vmax.f32 %v2573_v33, 0.0 }
 0x45c   : > { %v2632_v19 = vadd.f32 %v2616_v34, %v2600_v37 }
 0x45e   : > { %2648 = vst.msk [vmem:[%s3989_s15 + $0x40] sm:$0xff] %vm378_vm0, %v2632_v19  ;;  %v2664_v40 = vmax.f32 %v2632_v19, 0.0 }
 0x45f   : > { %v2574_v58 = vpop.f32.mrf.mxu1 }
 0x460   : > { %v2680_v53 = vpack.c.bf16 %v2664_v40, %v2664_v40  ;;  %v2575_v63 = vadd.f32 %v2574_v58, %v4262_v44 }
 0x462   : > { %2697 = vst.msk [vmem:[%s3985_s2 + $0x20] sm:$0xf] %vm2688_vm1, %v2680_v53  ;;  %v2601_v61 = vmax.f32 %v2575_v63, 0.0 }
 0x464   : > { %v2633_v18 = vadd.f32 %v2617_v42, %v2601_v61 }
 0x466   : > { %2649 = vst.msk [vmem:[%s3989_s15 + $0x48] sm:$0xff] %vm378_vm0, %v2633_v18  ;;  %v2665_v27 = vmax.f32 %v2633_v18, 0.0 }
 0x467   : > { %v2577_v52 = vpop.f32.mrf.mxu1 }
 0x468   : > { %v2681_v60 = vpack.c.bf16 %v2665_v27, %v2665_v27  ;;  %v2578_v55 = vadd.f32 %v2577_v52, %v4262_v44 }
 0x46a   : > { %2698 = vst.msk [vmem:[%s3985_s2 + $0x24] sm:$0xf] %vm2688_vm1, %v2681_v60  ;;  %v2602_v62 = vmax.f32 %v2578_v55, 0.0 }
 0x46c   : > { %v2634_v57 = vadd.f32 %v2618_v2, %v2602_v62 }
 0x46e   : > { %2650 = vst.msk [vmem:[%s3989_s15 + $0x50] sm:$0xff] %vm378_vm0, %v2634_v57  ;;  %v2666_v3 = vmax.f32 %v2634_v57, 0.0 }
 0x46f   : > { %v2579_v10 = vpop.f32.mrf.mxu1 }
 0x470   : > { %v2682_v5 = vpack.c.bf16 %v2666_v3, %v2666_v3  ;;  %v2580_v28 = vadd.f32 %v2579_v10, %v4262_v44 }
 0x472   : > { %2699 = vst.msk [vmem:[%s3985_s2 + $0x28] sm:$0xf] %vm2688_vm1, %v2682_v5  ;;  %v2603_v43 = vmax.f32 %v2580_v28, 0.0 }
 0x474   : > { %v2635_v38 = vadd.f32 %v2619_v36, %v2603_v43 }
 0x476   : > { %2651 = vst.msk [vmem:[%s3989_s15 + $0x58] sm:$0xff] %vm378_vm0, %v2635_v38  ;;  %v2667_v48 = vmax.f32 %v2635_v38, 0.0 }
 0x477   : > { %v2582_v11 = vpop.f32.mrf.mxu1 }
 0x478   : > { %v2683_v49 = vpack.c.bf16 %v2667_v48, %v2667_v48  ;;  %v2583_v20 = vadd.f32 %v2582_v11, %v4262_v44 }
 0x47a   : > { %2700 = vst.msk [vmem:[%s3985_s2 + $0x2c] sm:$0xf] %vm2688_vm1, %v2683_v49  ;;  %v2604_v59 = vmax.f32 %v2583_v20, 0.0 }
 0x47c   : > { %v2636_v6 = vadd.f32 %v2620_v9, %v2604_v59 }
 0x47e   : > { %2652 = vst.msk [vmem:[%s3989_s15 + $0x60] sm:$0xff] %vm378_vm0, %v2636_v6  ;;  %v2668_v39 = vmax.f32 %v2636_v6, 0.0 }
 0x47f   : > { %v2584_v56 = vpop.f32.mrf.mxu1 }
 0x480   : > { %v2684_v41 = vpack.c.bf16 %v2668_v39, %v2668_v39  ;;  %v2585_v51 = vadd.f32 %v2584_v56, %v4262_v44 }
 0x482   : > { %2701 = vst.msk [vmem:[%s3985_s2 + $0x30] sm:$0xf] %vm2688_vm1, %v2684_v41  ;;  %v2605_v29 = vmax.f32 %v2585_v51, 0.0 }
 0x484   : > { %v2637_v8 = vadd.f32 %v2621_v7, %v2605_v29 }
 0x486   : > { %2653 = vst.msk [vmem:[%s3989_s15 + $0x68] sm:$0xff] %vm378_vm0, %v2637_v8  ;;  %v2669_v26 = vmax.f32 %v2637_v8, 0.0 }
 0x487   : > { %v2587_v21 = vpop.f32.mrf.mxu1 }
 0x488   : > { %v2685_v12 = vpack.c.bf16 %v2669_v26, %v2669_v26  ;;  %v2588_v4 = vadd.f32 %v2587_v21, %v4262_v44 }
 0x48a   : > { %2702 = vst.msk [vmem:[%s3985_s2 + $0x34] sm:$0xf] %vm2688_vm1, %v2685_v12  ;;  %v2606_v1 = vmax.f32 %v2588_v4, 0.0 }
 0x48c   : > { %v2638_v14 = vadd.f32 %v2622_v47, %v2606_v1 }
 0x48e   : > { %2654 = vst.msk [vmem:[%s3989_s15 + $0x70] sm:$0xff] %vm378_vm0, %v2638_v14  ;;  %v2670_v15 = vmax.f32 %v2638_v14, 0.0 }
 0x48f   : > { %v2589_v25 = vpop.f32.mrf.mxu1 }
 0x490   : > { %v2686_v22 = vpack.c.bf16 %v2670_v15, %v2670_v15  ;;  %v2590_v50 = vadd.f32 %v2589_v25, %v4262_v44 }
 0x492   : > { %2703 = vst.msk [vmem:[%s3985_s2 + $0x38] sm:$0xf] %vm2688_vm1, %v2686_v22  ;;  %v2607_v35 = vmax.f32 %v2590_v50, 0.0 }
 0x494   : > { %v2639_v24 = vadd.f32 %v2623_v54, %v2607_v35 }
 0x496   : > { %2655 = vst.msk [vmem:[%s3989_s15 + $0x78] sm:$0xff] %vm378_vm0, %v2639_v24  ;;  %v2671_v13 = vmax.f32 %v2639_v24, 0.0 }
 0x497   : > { %3593 = shalt.err (!%p3590_p12)
}
 0x498   : > { %s3734_s15 = smov 128   ;;  %s3735_s28 = smov 8   ;;  %v2687_v44 = vpack.c.bf16 %v2671_v13, %v2671_v13 }
 0x499   : > { %3383 = dma.vmem_to_hbm [thread:$0]  (%p3843_p6), %s2747_s13, 2048, %s2749_s17, %s2711_s18, %s3734_s15, %s3734_s15, %s3735_s28  }
 0x49a   : > { %2704 = vst.msk [vmem:[%s3985_s2 + $0x3c] sm:$0xf] %vm2688_vm1, %v2687_v44  ;;  %s2706_s6 = scalar_lea.sflag [#allocation5], %s3915_s3  ;;  %s3608_s14 = sshra.s32 %s4370_s24, 4  ;;  %s3609_s14 = int_to_ptr.hbm [resolvable:$true] %s3608_s14 }
 0x49b   : > { %s3610_s27 = scalar_lea.hbm %s3609_s14, 64  ;;  %s3614_s16 = scalar_lea.hbm %s4476_s5, 256 }
 0x49c   : > { %p3611_p13 = scmp.ne.s32.totalorder %s3609_s14, %s3610_s27  ;;  %p3615_p11 = scmp.lt.s32.totalorder %s3609_s14, %s4476_s5 }
 0x49d   : > { %p3616_p0 = scmp.lt.s32.totalorder %s3614_s16, %s3610_s27 }
 0x49e   : > { %p3612_p1 = pnand %p3611_p13, %p3843_p6 }
 0x49f   : > { %p3617_p2 = por %p3616_p0, %p3615_p11 }
 0x4a0   : > { %p3613_p4 = pneg %p3612_p1 }
 0x4a2   : > { %p3618_p3 = pnand %p3617_p2, %p3613_p4 }
 0x4a4   : > { %3621 = shalt.err (!%p3618_p3)
}
 0x4a5   : > { %s3736_s3 = smov 64   ;;  %s3737_s2 = smov 4  }
 0x4a6   : > { %3382 = dma.vmem_to_hbm [thread:$0]  (%p3843_p6), %s4368_s19, 1024, %s4370_s24, %s2706_s6, %s3736_s3, %s3736_s3, %s3737_s2  }
 0x4a7 PF: > { %s4478_s13 = sld [smem:[#allocation15_spill]]  ;;  %p3404_p5 = scmp.ge.s32.totalorder %s3724_s7, 2 }
 0x4a9   : > { %p3395_p7 = pnand %p3404_p5, %p3849_p10 }
 0x4ab   : > { %p3396_p8 = pneg %p3395_p7 }
 0x4ad   : > { %s2763_s18 = sand.u32 1, %s4478_s13  }
 0x4ae   : > { %s2764_s0 = scalar_lea.sflag [#allocation5], %s2763_s18 }
 0x4af   : > { %3675 = dma.done.wait (%p3396_p8), %s2764_s0, 1024  }
 0x4b0   : > { %3677 = vsyncadd (%p3396_p8), %s2764_s0, 4294966272  ;;  %s2774_s15 = scalar_lea.sflag [#allocation10], %s2763_s18 }
 0x4b1   : > { %3679 = dma.done.wait (%p3396_p8), %s2774_s15, 2048  }
 0x4b2   : > { %3681 = vsyncadd (%p3396_p8), %s2774_s15, 4294965248  ;;  %s27_s7 = sadd.s32 1, %s3724_s7   ;;  %s4480_s19 = smov %s3888_s21 }
 0x4b3   : > { %p24_p9 = scmp.ge.s32.totalorder %s27_s7, 6   ;;  %s4481_s27 = sld [smem:[#allocation17_spill]] }
 0x4b4   : > { %s4482_s29 = sld [smem:[#allocation20_spill]]  ;;  %s4484_s21 = smov %s3688_s22 }
 0x4b5   : > { %s4483_s20 = sld [smem:[#allocation21_spill]]  ;;  %s4485_s22 = smov %s3692_s23 }
 0x4b6   : > { %s4486_s23 = smov %s3891_s12  ;;  %s4487_s24 = smov %s3700_s25 }
 0x4b7   : > { %s4488_s25 = smov %s3704_s26  ;;  %s4489_s26 = smov %s4480_s19 }
 0x4b8   : > { %s4490_s28 = smov %s3720_s30  ;;  %26 = sbr.rel (!%p24_p9) target bundleno = 18 (0x12), region = 137 }
 0x4bb   : > { %s4491_s30 = smov %s4483_s20 }
 0x4bd   :  { %2780 = vsyncpa [#allocation4], 1 }
 0x4be   :  { %2782 = vsyncpa [#allocation4 + $0x1], 1 }
 0x4bf   :  { %2783 = vsyncpa [#allocation7], 1 }
 0x4c0   :  { %2784 = vsyncpa [#allocation5], 1 }
 0x4c1   :  { %2786 = vsyncpa [#allocation5 + $0x1], 1 }
 0x4c2   :  { %2787 = vsyncpa [#allocation10], 1 }
 0x4c3   :  { %2789 = vsyncpa [#allocation10 + $0x1], 1 }

</bundles_post_ra>
